<compile_context>
chip_gen: v7x
topology: tpu7x:2x2x1
jax: 0.10.0
libtpu: 0.0.40
codegen_flags: <defaults>
</compile_context>

<pallas_src>
import functools

import numpy as np

import jax
import jax.numpy as jnp
from jax import lax
from jax.experimental import pallas as pl
from jax.experimental.pallas import tpu as pltpu


# ----------------------------------------------------------------------------
# Fused Pallas kernel: whole LDGs forward, whole batch, single grid step.
# ----------------------------------------------------------------------------
def _ldgs_kernel(x_ref, mask_ref, w_ref, b_ref, out_ref, *, N, C, H, W):
    HW = H * W
    L = N * HW

    # --- fold the batch into the lane axis: (C, N*HW), image-major lanes.
    #     (128-aligned lane concat: each image occupies HW = multiple-of-128
    #     lanes, so this is pure vreg placement, no lane shifts.)
    x = jnp.concatenate([x_ref[n] for n in range(N)], axis=1)

    # --- per-tap halo masks: loaded + broadcast ONCE, reused by all 6 convs.
    taps = []                               # (lane_offset, mask|None) per tap
    t = 0
    for oy in (-1, 0, 1):
        for ox in (-1, 0, 1):
            off = oy * W + ox
            if off == 0:
                taps.append((0, None))      # centre tap: always in-image
            else:
                taps.append((off, jnp.broadcast_to(mask_ref[t], (C, L))))
            t += 1

    def im2col(feat):
        """(C, L) -> (9C, L): 9 lane-rolled copies of the flattened map.

        Rolled-in lanes (per-image halo AND any cross-image / wrap-around
        contamination) coincide exactly with the out-of-image taps and are
        zeroed by the per-image mask.
        """
        parts = []
        for off, m in taps:
            if off == 0:
                parts.append(feat)
            else:
                parts.append(pltpu.roll(feat, shift=(-off) % L, axis=1) * m)
        return jnp.concatenate(parts, axis=0)           # (9C, L)

    def conv3x3(feat, widx, bidx):
        # Single K=9C MXU matmul per conv; output minor dim = L (lane-dense).
        y = jnp.dot(w_ref[widx], im2col(feat),
                    preferred_element_type=jnp.float32)  # (C, L)
        return y + b_ref[bidx]                           # (C, 1) lane-bcast

    def residual_block(feat, widx, bidx):
        h = jnp.maximum(conv3x3(feat, widx, bidx), 0.0)
        return feat + conv3x3(h, widx + 1, bidx + 1)

    def reduction(cat, j):                               # 1x1 conv + ReLU
        k = cat.shape[0]
        w = w_ref[6 + j][:, :k]                          # drop zero-padded K
        y = jnp.dot(w, cat, preferred_element_type=jnp.float32)
        return jnp.maximum(y + b_ref[6 + j], 0.0)

    rb1 = residual_block(x, 0, 0)
    cat1 = jnp.concatenate([x, rb1], axis=0)             # (2C, L) in VMEM
    out1 = reduction(cat1, 0)

    rb2 = residual_block(out1, 2, 2)
    cat2 = jnp.concatenate([cat1, rb2], axis=0)          # (3C, L)
    out2 = reduction(cat2, 1)

    rb3 = residual_block(out2, 4, 4)
    cat3 = jnp.concatenate([cat2, rb3], axis=0)          # (4C, L)
    out3 = reduction(cat3, 2)

    # --- unfold lanes back to per-image maps (128-aligned lane slices).
    for n in range(N):
        out_ref[n] = out3[:, n * HW:(n + 1) * HW].astype(out_ref.dtype)


# ----------------------------------------------------------------------------
# One-time host-side packing (hoisted out of the per-call / jit path).
# ----------------------------------------------------------------------------
def pack_ldgs_params(params, C):
    """Pack all 9 weights into one (9, C, 9C) slab and all 9 biases into one
    (9, C, 1) slab.  Slab order: RB1w1, RB1w2, RB2w1, RB2w2, RB3w1, RB3w2,
    red1, red2, red3 (reduction K zero-padded to 9C)."""
    K = 9 * C

    def w3x3(w_hwio):          # (3,3,Cin,Cout) -> (Cout, 9*Cin), tap-major
        cout = w_hwio.shape[-1]
        return np.transpose(np.asarray(w_hwio), (3, 0, 1, 2)).reshape(cout, K)

    ws, bs = [], []
    for name in ("RB1", "RB2", "RB3"):
        p = params[name]
        ws += [w3x3(p["w1"]), w3x3(p["w2"])]
        bs += [np.asarray(p["b1"]), np.asarray(p["b2"])]
    for name in ("red1", "red2", "red3"):
        p = params[name]
        w = np.asarray(p["w"]).T                             # (C, kC)
        ws.append(np.pad(w, ((0, 0), (0, K - w.shape[1]))))  # zero-pad K->9C
        bs.append(np.asarray(p["b"]))
    w_slab = jnp.asarray(np.stack(ws, 0).astype(np.float32))            # (9,C,9C)
    b_slab = jnp.asarray(np.stack(bs, 0)[:, :, None].astype(np.float32))  # (9,C,1)
    return w_slab, b_slab


def build_tap_mask(N, H, W):
    """(9, 1, N*H*W) f32 mask zeroing out-of-image taps (per-image, tiled
    along the folded batch-lane axis).  Built once on the host."""
    yy, xx = np.meshgrid(np.arange(H), np.arange(W), indexing="ij")
    yy, xx = yy.reshape(-1), xx.reshape(-1)
    rows = []
    for oy in (-1, 0, 1):
        for ox in (-1, 0, 1):
            valid = ((yy + oy >= 0) & (yy + oy < H) &
                     (xx + ox >= 0) & (xx + ox < W))
            rows.append(valid.astype(np.float32))
    mask9 = np.tile(np.stack(rows, 0), (1, N))               # (9, N*HW)
    return jnp.asarray(mask9[:, None, :])                    # (9, 1, N*HW)


# ----------------------------------------------------------------------------
# Forward wrapper: one pallas_call, single grid step, 4 inputs total.
# ----------------------------------------------------------------------------
def ldgs_forward(w_slab, b_slab, tap_mask, x_nchw):
    N, C, H, W = x_nchw.shape
    HW = H * W
    L = N * HW
    # Layout assumptions for lane-dense stores / clean sublane concats
    # (pad HW to a multiple of 128 and C to a multiple of 8 if they change).
    assert HW % 128 == 0 and C % 8 == 0, (HW, C)

    x_flat = x_nchw.reshape(N, C, HW)          # contiguous -> free reshape

    kern = functools.partial(_ldgs_kernel, N=N, C=C, H=H, W=W)
    out_flat = pl.pallas_call(
        kern,
        out_shape=jax.ShapeDtypeStruct((N, C, HW), x_nchw.dtype),
        grid=(1,),
        in_specs=[
            pl.BlockSpec((N, C, HW), lambda i: (0, 0, 0)),       # x
            pl.BlockSpec((9, 1, L), lambda i: (0, 0, 0)),        # tap mask
            pl.BlockSpec((9, C, 9 * C), lambda i: (0, 0, 0)),    # weight slab
            pl.BlockSpec((9, C, 1), lambda i: (0, 0, 0)),        # bias slab
        ],
        out_specs=pl.BlockSpec((N, C, HW), lambda i: (0, 0, 0)),
    )(x_flat, tap_mask, w_slab, b_slab)
    return out_flat.reshape(N, C, H, W)


# ----------------------------------------------------------------------------
# Parameters (deterministic synthetic init)
# ----------------------------------------------------------------------------
def init_ldgs_params(key, C):
    def conv_w(k, kh, kw, cin, cout):
        fan_in = kh * kw * cin
        return (jax.random.normal(k, (kh, kw, cin, cout), jnp.float32)
                * (2.0 / fan_in) ** 0.5)

    keys = jax.random.split(key, 18)
    params = {}
    ki = 0
    for name in ("RB1", "RB2", "RB3"):
        params[name] = dict(
            w1=conv_w(keys[ki + 0], 3, 3, C, C),
            b1=0.1 * jax.random.normal(keys[ki + 1], (C,), jnp.float32),
            w2=conv_w(keys[ki + 2], 3, 3, C, C),
            b2=0.1 * jax.random.normal(keys[ki + 3], (C,), jnp.float32),
        )
        ki += 4
    for i, name in enumerate(("red1", "red2", "red3")):
        cin = C * (i + 2)
        params[name] = dict(
            w=conv_w(keys[ki + 0], 1, 1, cin, C).reshape(cin, C),
            b=0.1 * jax.random.normal(keys[ki + 1], (C,), jnp.float32),
        )
        ki += 2
    return params


# ----------------------------------------------------------------------------
# Pure-JAX reference (correctness check), directly in NCHW.
# ----------------------------------------------------------------------------
def _conv_ref(x, w, b, padding):
    y = lax.conv_general_dilated(
        x, w, (1, 1), padding,
        dimension_numbers=("NCHW", "HWIO", "NCHW"),
        precision=lax.Precision.HIGHEST)
    return y + b[None, :, None, None]


def ldgs_ref(params, x_nchw):
    def rb(p, t):
        h = jnp.maximum(_conv_ref(t, p["w1"], p["b1"], "SAME"), 0.0)
        return t + _conv_ref(h, p["w2"], p["b2"], "SAME")

    def red(p, t):
        cin = p["w"].shape[0]
        w = p["w"].reshape(1, 1, cin, -1)
        return jnp.maximum(_conv_ref(t, w, p["b"], "VALID"), 0.0)

    c0 = o0 = x_nchw
    rb1 = rb(params["RB1"], o0)
    concat1 = jnp.concatenate([c0, rb1], axis=1)
    out1 = red(params["red1"], concat1)
    rb2 = rb(params["RB2"], out1)
    concat2 = jnp.concatenate([concat1, rb2], axis=1)
    out2 = red(params["red2"], concat2)
    rb3 = rb(params["RB3"], out2)
    concat3 = jnp.concatenate([concat2, rb3], axis=1)
    out3 = red(params["red3"], concat3)
    return out3


# ----------------------------------------------------------------------------
if __name__ == "__main__":
    N, C, H, W = 2, 8, 16, 16          # NCHW input, in_channels == out_channels
    key = jax.random.PRNGKey(0)
    kx, kp = jax.random.split(key)
    x = jax.random.normal(kx, (N, C, H, W), jnp.float32)
    params = init_ldgs_params(kp, C)

    # One-time host-side packing (hoisted out of the per-call path).
    w_slab, b_slab = pack_ldgs_params(params, C)
    tap_mask = build_tap_mask(N, H, W)

    fwd = jax.jit(ldgs_forward)
    out = jax.block_until_ready(fwd(w_slab, b_slab, tap_mask, x))

    ref = ldgs_ref(params, x)
    assert out.shape == (N, C, H, W), out.shape
    assert jnp.allclose(out, ref, rtol=1e-2, atol=1e-2), (
        float(jnp.max(jnp.abs(out - ref))))

    print("KERNEL_OK")
</pallas_src>

<mosaic_0001>
module attributes {stable_mosaic.version = 11 : i64} {
  func.func @_ldgs_kernel(%arg0: i32, %arg1: memref<2x8x256xf32, #tpu.memory_space<vmem>>, %arg2: memref<9x1x512xf32, #tpu.memory_space<vmem>>, %arg3: memref<9x8x72xf32, #tpu.memory_space<vmem>>, %arg4: memref<9x8x1xf32, #tpu.memory_space<vmem>>, %arg5: memref<2x8x256xf32, #tpu.memory_space<vmem>>) attributes {dimension_semantics = [#tpu.dimension_semantics<arbitrary>], iteration_bounds = array<i64: 1>, scalar_prefetch = 0 : i64, scratch_operands = 0 : i64, tpu.core_type = #tpu.core_type<tc>, window_params = [{pipeline_mode = #tpu.pipeline_mode<synchronous>, transform_indices = @transform_0, window_bounds = array<i64: 2, 8, 256>}, {pipeline_mode = #tpu.pipeline_mode<synchronous>, transform_indices = @transform_1, window_bounds = array<i64: 9, 1, 512>}, {pipeline_mode = #tpu.pipeline_mode<synchronous>, transform_indices = @transform_2, window_bounds = array<i64: 9, 8, 72>}, {pipeline_mode = #tpu.pipeline_mode<synchronous>, transform_indices = @transform_3, window_bounds = array<i64: 9, 8, 1>}, {pipeline_mode = #tpu.pipeline_mode<synchronous>, transform_indices = @transform_4, window_bounds = array<i64: 2, 8, 256>}]} {
    %c0 = arith.constant 0 : index
    %c0_0 = arith.constant 0 : index
    %c0_1 = arith.constant 0 : index
    %0 = vector.load %arg1[%c0, %c0_0, %c0_1] : memref<2x8x256xf32, #tpu.memory_space<vmem>>, vector<1x8x256xf32>
    %1 = vector.shape_cast %0 : vector<1x8x256xf32> to vector<8x256xf32>
    %c1 = arith.constant 1 : index
    %c0_2 = arith.constant 0 : index
    %c0_3 = arith.constant 0 : index
    %2 = vector.load %arg1[%c1, %c0_2, %c0_3] : memref<2x8x256xf32, #tpu.memory_space<vmem>>, vector<1x8x256xf32>
    %3 = vector.shape_cast %2 : vector<1x8x256xf32> to vector<8x256xf32>
    %4 = tpu.concatenate %1, %3 in 1 : vector<8x256xf32>, vector<8x256xf32> -> vector<8x512xf32>
    %c0_4 = arith.constant 0 : index
    %c0_5 = arith.constant 0 : index
    %c0_6 = arith.constant 0 : index
    %5 = vector.load %arg2[%c0_4, %c0_5, %c0_6] : memref<9x1x512xf32, #tpu.memory_space<vmem>>, vector<1x1x512xf32>
    %6 = vector.shape_cast %5 : vector<1x1x512xf32> to vector<1x512xf32>
    %7 = vector.shape_cast %6 : vector<1x512xf32> to vector<1x512xf32>
    %8 = vector.broadcast %7 : vector<1x512xf32> to vector<8x512xf32>
    %c1_7 = arith.constant 1 : index
    %c0_8 = arith.constant 0 : index
    %c0_9 = arith.constant 0 : index
    %9 = vector.load %arg2[%c1_7, %c0_8, %c0_9] : memref<9x1x512xf32, #tpu.memory_space<vmem>>, vector<1x1x512xf32>
    %10 = vector.shape_cast %9 : vector<1x1x512xf32> to vector<1x512xf32>
    %11 = vector.shape_cast %10 : vector<1x512xf32> to vector<1x512xf32>
    %12 = vector.broadcast %11 : vector<1x512xf32> to vector<8x512xf32>
    %c2 = arith.constant 2 : index
    %c0_10 = arith.constant 0 : index
    %c0_11 = arith.constant 0 : index
    %13 = vector.load %arg2[%c2, %c0_10, %c0_11] : memref<9x1x512xf32, #tpu.memory_space<vmem>>, vector<1x1x512xf32>
    %14 = vector.shape_cast %13 : vector<1x1x512xf32> to vector<1x512xf32>
    %15 = vector.shape_cast %14 : vector<1x512xf32> to vector<1x512xf32>
    %16 = vector.broadcast %15 : vector<1x512xf32> to vector<8x512xf32>
    %c3 = arith.constant 3 : index
    %c0_12 = arith.constant 0 : index
    %c0_13 = arith.constant 0 : index
    %17 = vector.load %arg2[%c3, %c0_12, %c0_13] : memref<9x1x512xf32, #tpu.memory_space<vmem>>, vector<1x1x512xf32>
    %18 = vector.shape_cast %17 : vector<1x1x512xf32> to vector<1x512xf32>
    %19 = vector.shape_cast %18 : vector<1x512xf32> to vector<1x512xf32>
    %20 = vector.broadcast %19 : vector<1x512xf32> to vector<8x512xf32>
    %c5 = arith.constant 5 : index
    %c0_14 = arith.constant 0 : index
    %c0_15 = arith.constant 0 : index
    %21 = vector.load %arg2[%c5, %c0_14, %c0_15] : memref<9x1x512xf32, #tpu.memory_space<vmem>>, vector<1x1x512xf32>
    %22 = vector.shape_cast %21 : vector<1x1x512xf32> to vector<1x512xf32>
    %23 = vector.shape_cast %22 : vector<1x512xf32> to vector<1x512xf32>
    %24 = vector.broadcast %23 : vector<1x512xf32> to vector<8x512xf32>
    %c6 = arith.constant 6 : index
    %c0_16 = arith.constant 0 : index
    %c0_17 = arith.constant 0 : index
    %25 = vector.load %arg2[%c6, %c0_16, %c0_17] : memref<9x1x512xf32, #tpu.memory_space<vmem>>, vector<1x1x512xf32>
    %26 = vector.shape_cast %25 : vector<1x1x512xf32> to vector<1x512xf32>
    %27 = vector.shape_cast %26 : vector<1x512xf32> to vector<1x512xf32>
    %28 = vector.broadcast %27 : vector<1x512xf32> to vector<8x512xf32>
    %c7 = arith.constant 7 : index
    %c0_18 = arith.constant 0 : index
    %c0_19 = arith.constant 0 : index
    %29 = vector.load %arg2[%c7, %c0_18, %c0_19] : memref<9x1x512xf32, #tpu.memory_space<vmem>>, vector<1x1x512xf32>
    %30 = vector.shape_cast %29 : vector<1x1x512xf32> to vector<1x512xf32>
    %31 = vector.shape_cast %30 : vector<1x512xf32> to vector<1x512xf32>
    %32 = vector.broadcast %31 : vector<1x512xf32> to vector<8x512xf32>
    %c8 = arith.constant 8 : index
    %c0_20 = arith.constant 0 : index
    %c0_21 = arith.constant 0 : index
    %33 = vector.load %arg2[%c8, %c0_20, %c0_21] : memref<9x1x512xf32, #tpu.memory_space<vmem>>, vector<1x1x512xf32>
    %34 = vector.shape_cast %33 : vector<1x1x512xf32> to vector<1x512xf32>
    %35 = vector.shape_cast %34 : vector<1x512xf32> to vector<1x512xf32>
    %36 = vector.broadcast %35 : vector<1x512xf32> to vector<8x512xf32>
    %c0_22 = arith.constant 0 : index
    %c0_23 = arith.constant 0 : index
    %c0_24 = arith.constant 0 : index
    %37 = vector.load %arg3[%c0_22, %c0_23, %c0_24] : memref<9x8x72xf32, #tpu.memory_space<vmem>>, vector<1x8x72xf32>
    %38 = vector.shape_cast %37 : vector<1x8x72xf32> to vector<8x72xf32>
    %c17_i32 = arith.constant 17 : i32
    %39 = tpu.dynamic_rotate %4 by %c17_i32 dim 1 : vector<8x512xf32>, i32 -> vector<8x512xf32>
    %40 = arith.mulf %39, %8 : vector<8x512xf32>
    %c16_i32 = arith.constant 16 : i32
    %41 = tpu.dynamic_rotate %4 by %c16_i32 dim 1 : vector<8x512xf32>, i32 -> vector<8x512xf32>
    %42 = arith.mulf %41, %12 : vector<8x512xf32>
    %c15_i32 = arith.constant 15 : i32
    %43 = tpu.dynamic_rotate %4 by %c15_i32 dim 1 : vector<8x512xf32>, i32 -> vector<8x512xf32>
    %44 = arith.mulf %43, %16 : vector<8x512xf32>
    %c1_i32 = arith.constant 1 : i32
    %45 = tpu.dynamic_rotate %4 by %c1_i32 dim 1 : vector<8x512xf32>, i32 -> vector<8x512xf32>
    %46 = arith.mulf %45, %20 : vector<8x512xf32>
    %c511_i32 = arith.constant 511 : i32
    %47 = tpu.dynamic_rotate %4 by %c511_i32 dim 1 : vector<8x512xf32>, i32 -> vector<8x512xf32>
    %48 = arith.mulf %47, %24 : vector<8x512xf32>
    %c497_i32 = arith.constant 497 : i32
    %49 = tpu.dynamic_rotate %4 by %c497_i32 dim 1 : vector<8x512xf32>, i32 -> vector<8x512xf32>
    %50 = arith.mulf %49, %28 : vector<8x512xf32>
    %c496_i32 = arith.constant 496 : i32
    %51 = tpu.dynamic_rotate %4 by %c496_i32 dim 1 : vector<8x512xf32>, i32 -> vector<8x512xf32>
    %52 = arith.mulf %51, %32 : vector<8x512xf32>
    %c495_i32 = arith.constant 495 : i32
    %53 = tpu.dynamic_rotate %4 by %c495_i32 dim 1 : vector<8x512xf32>, i32 -> vector<8x512xf32>
    %54 = arith.mulf %53, %36 : vector<8x512xf32>
    %55 = tpu.concatenate %40, %42, %44, %46, %4, %48, %50, %52, %54 in 0 : vector<8x512xf32>, vector<8x512xf32>, vector<8x512xf32>, vector<8x512xf32>, vector<8x512xf32>, vector<8x512xf32>, vector<8x512xf32>, vector<8x512xf32>, vector<8x512xf32> -> vector<72x512xf32>
    %cst = arith.constant dense<0.000000e+00> : vector<8x512xf32>
    %56 = tpu.matmul %38, %55, %cst {dimension_numbers = #tpu.dot_dimension_numbers<[1], [0], [0], [1], [0, 0, 1, 1], [], []>} : vector<8x72xf32>, vector<72x512xf32>, vector<8x512xf32> -> vector<8x512xf32>
    %c0_25 = arith.constant 0 : index
    %c0_26 = arith.constant 0 : index
    %c0_27 = arith.constant 0 : index
    %57 = vector.load %arg4[%c0_25, %c0_26, %c0_27] : memref<9x8x1xf32, #tpu.memory_space<vmem>>, vector<1x8x1xf32>
    %58 = vector.shape_cast %57 : vector<1x8x1xf32> to vector<8x1xf32>
    %59 = vector.broadcast %58 : vector<8x1xf32> to vector<8x512xf32>
    %60 = arith.addf %56, %59 : vector<8x512xf32>
    %cst_28 = arith.constant 0.000000e+00 : f32
    %61 = vector.broadcast %cst_28 : f32 to vector<8x512xf32>
    %62 = arith.maximumf %60, %61 : vector<8x512xf32>
    %c1_29 = arith.constant 1 : index
    %c0_30 = arith.constant 0 : index
    %c0_31 = arith.constant 0 : index
    %63 = vector.load %arg3[%c1_29, %c0_30, %c0_31] : memref<9x8x72xf32, #tpu.memory_space<vmem>>, vector<1x8x72xf32>
    %64 = vector.shape_cast %63 : vector<1x8x72xf32> to vector<8x72xf32>
    %c17_i32_32 = arith.constant 17 : i32
    %65 = tpu.dynamic_rotate %62 by %c17_i32_32 dim 1 : vector<8x512xf32>, i32 -> vector<8x512xf32>
    %66 = arith.mulf %65, %8 : vector<8x512xf32>
    %c16_i32_33 = arith.constant 16 : i32
    %67 = tpu.dynamic_rotate %62 by %c16_i32_33 dim 1 : vector<8x512xf32>, i32 -> vector<8x512xf32>
    %68 = arith.mulf %67, %12 : vector<8x512xf32>
    %c15_i32_34 = arith.constant 15 : i32
    %69 = tpu.dynamic_rotate %62 by %c15_i32_34 dim 1 : vector<8x512xf32>, i32 -> vector<8x512xf32>
    %70 = arith.mulf %69, %16 : vector<8x512xf32>
    %c1_i32_35 = arith.constant 1 : i32
    %71 = tpu.dynamic_rotate %62 by %c1_i32_35 dim 1 : vector<8x512xf32>, i32 -> vector<8x512xf32>
    %72 = arith.mulf %71, %20 : vector<8x512xf32>
    %c511_i32_36 = arith.constant 511 : i32
    %73 = tpu.dynamic_rotate %62 by %c511_i32_36 dim 1 : vector<8x512xf32>, i32 -> vector<8x512xf32>
    %74 = arith.mulf %73, %24 : vector<8x512xf32>
    %c497_i32_37 = arith.constant 497 : i32
    %75 = tpu.dynamic_rotate %62 by %c497_i32_37 dim 1 : vector<8x512xf32>, i32 -> vector<8x512xf32>
    %76 = arith.mulf %75, %28 : vector<8x512xf32>
    %c496_i32_38 = arith.constant 496 : i32
    %77 = tpu.dynamic_rotate %62 by %c496_i32_38 dim 1 : vector<8x512xf32>, i32 -> vector<8x512xf32>
    %78 = arith.mulf %77, %32 : vector<8x512xf32>
    %c495_i32_39 = arith.constant 495 : i32
    %79 = tpu.dynamic_rotate %62 by %c495_i32_39 dim 1 : vector<8x512xf32>, i32 -> vector<8x512xf32>
    %80 = arith.mulf %79, %36 : vector<8x512xf32>
    %81 = tpu.concatenate %66, %68, %70, %72, %62, %74, %76, %78, %80 in 0 : vector<8x512xf32>, vector<8x512xf32>, vector<8x512xf32>, vector<8x512xf32>, vector<8x512xf32>, vector<8x512xf32>, vector<8x512xf32>, vector<8x512xf32>, vector<8x512xf32> -> vector<72x512xf32>
    %cst_40 = arith.constant dense<0.000000e+00> : vector<8x512xf32>
    %82 = tpu.matmul %64, %81, %cst_40 {dimension_numbers = #tpu.dot_dimension_numbers<[1], [0], [0], [1], [0, 0, 1, 1], [], []>} : vector<8x72xf32>, vector<72x512xf32>, vector<8x512xf32> -> vector<8x512xf32>
    %c1_41 = arith.constant 1 : index
    %c0_42 = arith.constant 0 : index
    %c0_43 = arith.constant 0 : index
    %83 = vector.load %arg4[%c1_41, %c0_42, %c0_43] : memref<9x8x1xf32, #tpu.memory_space<vmem>>, vector<1x8x1xf32>
    %84 = vector.shape_cast %83 : vector<1x8x1xf32> to vector<8x1xf32>
    %85 = vector.broadcast %84 : vector<8x1xf32> to vector<8x512xf32>
    %86 = arith.addf %82, %85 : vector<8x512xf32>
    %87 = arith.addf %4, %86 : vector<8x512xf32>
    %88 = tpu.concatenate %4, %87 in 0 : vector<8x512xf32>, vector<8x512xf32> -> vector<16x512xf32>
    %c6_44 = arith.constant 6 : index
    %c0_45 = arith.constant 0 : index
    %c0_46 = arith.constant 0 : index
    %89 = vector.load %arg3[%c6_44, %c0_45, %c0_46] : memref<9x8x72xf32, #tpu.memory_space<vmem>>, vector<1x8x72xf32>
    %90 = vector.shape_cast %89 : vector<1x8x72xf32> to vector<8x72xf32>
    %91 = vector.extract_strided_slice %90 {offsets = [0, 0], sizes = [8, 16], strides = [1, 1]} : vector<8x72xf32> to vector<8x16xf32>
    %cst_47 = arith.constant dense<0.000000e+00> : vector<8x512xf32>
    %92 = tpu.matmul %91, %88, %cst_47 {dimension_numbers = #tpu.dot_dimension_numbers<[1], [0], [0], [1], [0, 0, 1, 1], [], []>} : vector<8x16xf32>, vector<16x512xf32>, vector<8x512xf32> -> vector<8x512xf32>
    %c6_48 = arith.constant 6 : index
    %c0_49 = arith.constant 0 : index
    %c0_50 = arith.constant 0 : index
    %93 = vector.load %arg4[%c6_48, %c0_49, %c0_50] : memref<9x8x1xf32, #tpu.memory_space<vmem>>, vector<1x8x1xf32>
    %94 = vector.shape_cast %93 : vector<1x8x1xf32> to vector<8x1xf32>
    %95 = vector.broadcast %94 : vector<8x1xf32> to vector<8x512xf32>
    %96 = arith.addf %92, %95 : vector<8x512xf32>
    %cst_51 = arith.constant 0.000000e+00 : f32
    %97 = vector.broadcast %cst_51 : f32 to vector<8x512xf32>
    %98 = arith.maximumf %96, %97 : vector<8x512xf32>
    %c2_52 = arith.constant 2 : index
    %c0_53 = arith.constant 0 : index
    %c0_54 = arith.constant 0 : index
    %99 = vector.load %arg3[%c2_52, %c0_53, %c0_54] : memref<9x8x72xf32, #tpu.memory_space<vmem>>, vector<1x8x72xf32>
    %100 = vector.shape_cast %99 : vector<1x8x72xf32> to vector<8x72xf32>
    %c17_i32_55 = arith.constant 17 : i32
    %101 = tpu.dynamic_rotate %98 by %c17_i32_55 dim 1 : vector<8x512xf32>, i32 -> vector<8x512xf32>
    %102 = arith.mulf %101, %8 : vector<8x512xf32>
    %c16_i32_56 = arith.constant 16 : i32
    %103 = tpu.dynamic_rotate %98 by %c16_i32_56 dim 1 : vector<8x512xf32>, i32 -> vector<8x512xf32>
    %104 = arith.mulf %103, %12 : vector<8x512xf32>
    %c15_i32_57 = arith.constant 15 : i32
    %105 = tpu.dynamic_rotate %98 by %c15_i32_57 dim 1 : vector<8x512xf32>, i32 -> vector<8x512xf32>
    %106 = arith.mulf %105, %16 : vector<8x512xf32>
    %c1_i32_58 = arith.constant 1 : i32
    %107 = tpu.dynamic_rotate %98 by %c1_i32_58 dim 1 : vector<8x512xf32>, i32 -> vector<8x512xf32>
    %108 = arith.mulf %107, %20 : vector<8x512xf32>
    %c511_i32_59 = arith.constant 511 : i32
    %109 = tpu.dynamic_rotate %98 by %c511_i32_59 dim 1 : vector<8x512xf32>, i32 -> vector<8x512xf32>
    %110 = arith.mulf %109, %24 : vector<8x512xf32>
    %c497_i32_60 = arith.constant 497 : i32
    %111 = tpu.dynamic_rotate %98 by %c497_i32_60 dim 1 : vector<8x512xf32>, i32 -> vector<8x512xf32>
    %112 = arith.mulf %111, %28 : vector<8x512xf32>
    %c496_i32_61 = arith.constant 496 : i32
    %113 = tpu.dynamic_rotate %98 by %c496_i32_61 dim 1 : vector<8x512xf32>, i32 -> vector<8x512xf32>
    %114 = arith.mulf %113, %32 : vector<8x512xf32>
    %c495_i32_62 = arith.constant 495 : i32
    %115 = tpu.dynamic_rotate %98 by %c495_i32_62 dim 1 : vector<8x512xf32>, i32 -> vector<8x512xf32>
    %116 = arith.mulf %115, %36 : vector<8x512xf32>
    %117 = tpu.concatenate %102, %104, %106, %108, %98, %110, %112, %114, %116 in 0 : vector<8x512xf32>, vector<8x512xf32>, vector<8x512xf32>, vector<8x512xf32>, vector<8x512xf32>, vector<8x512xf32>, vector<8x512xf32>, vector<8x512xf32>, vector<8x512xf32> -> vector<72x512xf32>
    %cst_63 = arith.constant dense<0.000000e+00> : vector<8x512xf32>
    %118 = tpu.matmul %100, %117, %cst_63 {dimension_numbers = #tpu.dot_dimension_numbers<[1], [0], [0], [1], [0, 0, 1, 1], [], []>} : vector<8x72xf32>, vector<72x512xf32>, vector<8x512xf32> -> vector<8x512xf32>
    %c2_64 = arith.constant 2 : index
    %c0_65 = arith.constant 0 : index
    %c0_66 = arith.constant 0 : index
    %119 = vector.load %arg4[%c2_64, %c0_65, %c0_66] : memref<9x8x1xf32, #tpu.memory_space<vmem>>, vector<1x8x1xf32>
    %120 = vector.shape_cast %119 : vector<1x8x1xf32> to vector<8x1xf32>
    %121 = vector.broadcast %120 : vector<8x1xf32> to vector<8x512xf32>
    %122 = arith.addf %118, %121 : vector<8x512xf32>
    %cst_67 = arith.constant 0.000000e+00 : f32
    %123 = vector.broadcast %cst_67 : f32 to vector<8x512xf32>
    %124 = arith.maximumf %122, %123 : vector<8x512xf32>
    %c3_68 = arith.constant 3 : index
    %c0_69 = arith.constant 0 : index
    %c0_70 = arith.constant 0 : index
    %125 = vector.load %arg3[%c3_68, %c0_69, %c0_70] : memref<9x8x72xf32, #tpu.memory_space<vmem>>, vector<1x8x72xf32>
    %126 = vector.shape_cast %125 : vector<1x8x72xf32> to vector<8x72xf32>
    %c17_i32_71 = arith.constant 17 : i32
    %127 = tpu.dynamic_rotate %124 by %c17_i32_71 dim 1 : vector<8x512xf32>, i32 -> vector<8x512xf32>
    %128 = arith.mulf %127, %8 : vector<8x512xf32>
    %c16_i32_72 = arith.constant 16 : i32
    %129 = tpu.dynamic_rotate %124 by %c16_i32_72 dim 1 : vector<8x512xf32>, i32 -> vector<8x512xf32>
    %130 = arith.mulf %129, %12 : vector<8x512xf32>
    %c15_i32_73 = arith.constant 15 : i32
    %131 = tpu.dynamic_rotate %124 by %c15_i32_73 dim 1 : vector<8x512xf32>, i32 -> vector<8x512xf32>
    %132 = arith.mulf %131, %16 : vector<8x512xf32>
    %c1_i32_74 = arith.constant 1 : i32
    %133 = tpu.dynamic_rotate %124 by %c1_i32_74 dim 1 : vector<8x512xf32>, i32 -> vector<8x512xf32>
    %134 = arith.mulf %133, %20 : vector<8x512xf32>
    %c511_i32_75 = arith.constant 511 : i32
    %135 = tpu.dynamic_rotate %124 by %c511_i32_75 dim 1 : vector<8x512xf32>, i32 -> vector<8x512xf32>
    %136 = arith.mulf %135, %24 : vector<8x512xf32>
    %c497_i32_76 = arith.constant 497 : i32
    %137 = tpu.dynamic_rotate %124 by %c497_i32_76 dim 1 : vector<8x512xf32>, i32 -> vector<8x512xf32>
    %138 = arith.mulf %137, %28 : vector<8x512xf32>
    %c496_i32_77 = arith.constant 496 : i32
    %139 = tpu.dynamic_rotate %124 by %c496_i32_77 dim 1 : vector<8x512xf32>, i32 -> vector<8x512xf32>
    %140 = arith.mulf %139, %32 : vector<8x512xf32>
    %c495_i32_78 = arith.constant 495 : i32
    %141 = tpu.dynamic_rotate %124 by %c495_i32_78 dim 1 : vector<8x512xf32>, i32 -> vector<8x512xf32>
    %142 = arith.mulf %141, %36 : vector<8x512xf32>
    %143 = tpu.concatenate %128, %130, %132, %134, %124, %136, %138, %140, %142 in 0 : vector<8x512xf32>, vector<8x512xf32>, vector<8x512xf32>, vector<8x512xf32>, vector<8x512xf32>, vector<8x512xf32>, vector<8x512xf32>, vector<8x512xf32>, vector<8x512xf32> -> vector<72x512xf32>
    %cst_79 = arith.constant dense<0.000000e+00> : vector<8x512xf32>
    %144 = tpu.matmul %126, %143, %cst_79 {dimension_numbers = #tpu.dot_dimension_numbers<[1], [0], [0], [1], [0, 0, 1, 1], [], []>} : vector<8x72xf32>, vector<72x512xf32>, vector<8x512xf32> -> vector<8x512xf32>
    %c3_80 = arith.constant 3 : index
    %c0_81 = arith.constant 0 : index
    %c0_82 = arith.constant 0 : index
    %145 = vector.load %arg4[%c3_80, %c0_81, %c0_82] : memref<9x8x1xf32, #tpu.memory_space<vmem>>, vector<1x8x1xf32>
    %146 = vector.shape_cast %145 : vector<1x8x1xf32> to vector<8x1xf32>
    %147 = vector.broadcast %146 : vector<8x1xf32> to vector<8x512xf32>
    %148 = arith.addf %144, %147 : vector<8x512xf32>
    %149 = arith.addf %98, %148 : vector<8x512xf32>
    %150 = tpu.concatenate %88, %149 in 0 : vector<16x512xf32>, vector<8x512xf32> -> vector<24x512xf32>
    %c7_83 = arith.constant 7 : index
    %c0_84 = arith.constant 0 : index
    %c0_85 = arith.constant 0 : index
    %151 = vector.load %arg3[%c7_83, %c0_84, %c0_85] : memref<9x8x72xf32, #tpu.memory_space<vmem>>, vector<1x8x72xf32>
    %152 = vector.shape_cast %151 : vector<1x8x72xf32> to vector<8x72xf32>
    %153 = vector.extract_strided_slice %152 {offsets = [0, 0], sizes = [8, 24], strides = [1, 1]} : vector<8x72xf32> to vector<8x24xf32>
    %cst_86 = arith.constant dense<0.000000e+00> : vector<8x512xf32>
    %154 = tpu.matmul %153, %150, %cst_86 {dimension_numbers = #tpu.dot_dimension_numbers<[1], [0], [0], [1], [0, 0, 1, 1], [], []>} : vector<8x24xf32>, vector<24x512xf32>, vector<8x512xf32> -> vector<8x512xf32>
    %c7_87 = arith.constant 7 : index
    %c0_88 = arith.constant 0 : index
    %c0_89 = arith.constant 0 : index
    %155 = vector.load %arg4[%c7_87, %c0_88, %c0_89] : memref<9x8x1xf32, #tpu.memory_space<vmem>>, vector<1x8x1xf32>
    %156 = vector.shape_cast %155 : vector<1x8x1xf32> to vector<8x1xf32>
    %157 = vector.broadcast %156 : vector<8x1xf32> to vector<8x512xf32>
    %158 = arith.addf %154, %157 : vector<8x512xf32>
    %cst_90 = arith.constant 0.000000e+00 : f32
    %159 = vector.broadcast %cst_90 : f32 to vector<8x512xf32>
    %160 = arith.maximumf %158, %159 : vector<8x512xf32>
    %c4 = arith.constant 4 : index
    %c0_91 = arith.constant 0 : index
    %c0_92 = arith.constant 0 : index
    %161 = vector.load %arg3[%c4, %c0_91, %c0_92] : memref<9x8x72xf32, #tpu.memory_space<vmem>>, vector<1x8x72xf32>
    %162 = vector.shape_cast %161 : vector<1x8x72xf32> to vector<8x72xf32>
    %c17_i32_93 = arith.constant 17 : i32
    %163 = tpu.dynamic_rotate %160 by %c17_i32_93 dim 1 : vector<8x512xf32>, i32 -> vector<8x512xf32>
    %164 = arith.mulf %163, %8 : vector<8x512xf32>
    %c16_i32_94 = arith.constant 16 : i32
    %165 = tpu.dynamic_rotate %160 by %c16_i32_94 dim 1 : vector<8x512xf32>, i32 -> vector<8x512xf32>
    %166 = arith.mulf %165, %12 : vector<8x512xf32>
    %c15_i32_95 = arith.constant 15 : i32
    %167 = tpu.dynamic_rotate %160 by %c15_i32_95 dim 1 : vector<8x512xf32>, i32 -> vector<8x512xf32>
    %168 = arith.mulf %167, %16 : vector<8x512xf32>
    %c1_i32_96 = arith.constant 1 : i32
    %169 = tpu.dynamic_rotate %160 by %c1_i32_96 dim 1 : vector<8x512xf32>, i32 -> vector<8x512xf32>
    %170 = arith.mulf %169, %20 : vector<8x512xf32>
    %c511_i32_97 = arith.constant 511 : i32
    %171 = tpu.dynamic_rotate %160 by %c511_i32_97 dim 1 : vector<8x512xf32>, i32 -> vector<8x512xf32>
    %172 = arith.mulf %171, %24 : vector<8x512xf32>
    %c497_i32_98 = arith.constant 497 : i32
    %173 = tpu.dynamic_rotate %160 by %c497_i32_98 dim 1 : vector<8x512xf32>, i32 -> vector<8x512xf32>
    %174 = arith.mulf %173, %28 : vector<8x512xf32>
    %c496_i32_99 = arith.constant 496 : i32
    %175 = tpu.dynamic_rotate %160 by %c496_i32_99 dim 1 : vector<8x512xf32>, i32 -> vector<8x512xf32>
    %176 = arith.mulf %175, %32 : vector<8x512xf32>
    %c495_i32_100 = arith.constant 495 : i32
    %177 = tpu.dynamic_rotate %160 by %c495_i32_100 dim 1 : vector<8x512xf32>, i32 -> vector<8x512xf32>
    %178 = arith.mulf %177, %36 : vector<8x512xf32>
    %179 = tpu.concatenate %164, %166, %168, %170, %160, %172, %174, %176, %178 in 0 : vector<8x512xf32>, vector<8x512xf32>, vector<8x512xf32>, vector<8x512xf32>, vector<8x512xf32>, vector<8x512xf32>, vector<8x512xf32>, vector<8x512xf32>, vector<8x512xf32> -> vector<72x512xf32>
    %cst_101 = arith.constant dense<0.000000e+00> : vector<8x512xf32>
    %180 = tpu.matmul %162, %179, %cst_101 {dimension_numbers = #tpu.dot_dimension_numbers<[1], [0], [0], [1], [0, 0, 1, 1], [], []>} : vector<8x72xf32>, vector<72x512xf32>, vector<8x512xf32> -> vector<8x512xf32>
    %c4_102 = arith.constant 4 : index
    %c0_103 = arith.constant 0 : index
    %c0_104 = arith.constant 0 : index
    %181 = vector.load %arg4[%c4_102, %c0_103, %c0_104] : memref<9x8x1xf32, #tpu.memory_space<vmem>>, vector<1x8x1xf32>
    %182 = vector.shape_cast %181 : vector<1x8x1xf32> to vector<8x1xf32>
    %183 = vector.broadcast %182 : vector<8x1xf32> to vector<8x512xf32>
    %184 = arith.addf %180, %183 : vector<8x512xf32>
    %cst_105 = arith.constant 0.000000e+00 : f32
    %185 = vector.broadcast %cst_105 : f32 to vector<8x512xf32>
    %186 = arith.maximumf %184, %185 : vector<8x512xf32>
    %c5_106 = arith.constant 5 : index
    %c0_107 = arith.constant 0 : index
    %c0_108 = arith.constant 0 : index
    %187 = vector.load %arg3[%c5_106, %c0_107, %c0_108] : memref<9x8x72xf32, #tpu.memory_space<vmem>>, vector<1x8x72xf32>
    %188 = vector.shape_cast %187 : vector<1x8x72xf32> to vector<8x72xf32>
    %c17_i32_109 = arith.constant 17 : i32
    %189 = tpu.dynamic_rotate %186 by %c17_i32_109 dim 1 : vector<8x512xf32>, i32 -> vector<8x512xf32>
    %190 = arith.mulf %189, %8 : vector<8x512xf32>
    %c16_i32_110 = arith.constant 16 : i32
    %191 = tpu.dynamic_rotate %186 by %c16_i32_110 dim 1 : vector<8x512xf32>, i32 -> vector<8x512xf32>
    %192 = arith.mulf %191, %12 : vector<8x512xf32>
    %c15_i32_111 = arith.constant 15 : i32
    %193 = tpu.dynamic_rotate %186 by %c15_i32_111 dim 1 : vector<8x512xf32>, i32 -> vector<8x512xf32>
    %194 = arith.mulf %193, %16 : vector<8x512xf32>
    %c1_i32_112 = arith.constant 1 : i32
    %195 = tpu.dynamic_rotate %186 by %c1_i32_112 dim 1 : vector<8x512xf32>, i32 -> vector<8x512xf32>
    %196 = arith.mulf %195, %20 : vector<8x512xf32>
    %c511_i32_113 = arith.constant 511 : i32
    %197 = tpu.dynamic_rotate %186 by %c511_i32_113 dim 1 : vector<8x512xf32>, i32 -> vector<8x512xf32>
    %198 = arith.mulf %197, %24 : vector<8x512xf32>
    %c497_i32_114 = arith.constant 497 : i32
    %199 = tpu.dynamic_rotate %186 by %c497_i32_114 dim 1 : vector<8x512xf32>, i32 -> vector<8x512xf32>
    %200 = arith.mulf %199, %28 : vector<8x512xf32>
    %c496_i32_115 = arith.constant 496 : i32
    %201 = tpu.dynamic_rotate %186 by %c496_i32_115 dim 1 : vector<8x512xf32>, i32 -> vector<8x512xf32>
    %202 = arith.mulf %201, %32 : vector<8x512xf32>
    %c495_i32_116 = arith.constant 495 : i32
    %203 = tpu.dynamic_rotate %186 by %c495_i32_116 dim 1 : vector<8x512xf32>, i32 -> vector<8x512xf32>
    %204 = arith.mulf %203, %36 : vector<8x512xf32>
    %205 = tpu.concatenate %190, %192, %194, %196, %186, %198, %200, %202, %204 in 0 : vector<8x512xf32>, vector<8x512xf32>, vector<8x512xf32>, vector<8x512xf32>, vector<8x512xf32>, vector<8x512xf32>, vector<8x512xf32>, vector<8x512xf32>, vector<8x512xf32> -> vector<72x512xf32>
    %cst_117 = arith.constant dense<0.000000e+00> : vector<8x512xf32>
    %206 = tpu.matmul %188, %205, %cst_117 {dimension_numbers = #tpu.dot_dimension_numbers<[1], [0], [0], [1], [0, 0, 1, 1], [], []>} : vector<8x72xf32>, vector<72x512xf32>, vector<8x512xf32> -> vector<8x512xf32>
    %c5_118 = arith.constant 5 : index
    %c0_119 = arith.constant 0 : index
    %c0_120 = arith.constant 0 : index
    %207 = vector.load %arg4[%c5_118, %c0_119, %c0_120] : memref<9x8x1xf32, #tpu.memory_space<vmem>>, vector<1x8x1xf32>
    %208 = vector.shape_cast %207 : vector<1x8x1xf32> to vector<8x1xf32>
    %209 = vector.broadcast %208 : vector<8x1xf32> to vector<8x512xf32>
    %210 = arith.addf %206, %209 : vector<8x512xf32>
    %211 = arith.addf %160, %210 : vector<8x512xf32>
    %212 = tpu.concatenate %150, %211 in 0 : vector<24x512xf32>, vector<8x512xf32> -> vector<32x512xf32>
    %c8_121 = arith.constant 8 : index
    %c0_122 = arith.constant 0 : index
    %c0_123 = arith.constant 0 : index
    %213 = vector.load %arg3[%c8_121, %c0_122, %c0_123] : memref<9x8x72xf32, #tpu.memory_space<vmem>>, vector<1x8x72xf32>
    %214 = vector.shape_cast %213 : vector<1x8x72xf32> to vector<8x72xf32>
    %215 = vector.extract_strided_slice %214 {offsets = [0, 0], sizes = [8, 32], strides = [1, 1]} : vector<8x72xf32> to vector<8x32xf32>
    %cst_124 = arith.constant dense<0.000000e+00> : vector<8x512xf32>
    %216 = tpu.matmul %215, %212, %cst_124 {dimension_numbers = #tpu.dot_dimension_numbers<[1], [0], [0], [1], [0, 0, 1, 1], [], []>} : vector<8x32xf32>, vector<32x512xf32>, vector<8x512xf32> -> vector<8x512xf32>
    %c8_125 = arith.constant 8 : index
    %c0_126 = arith.constant 0 : index
    %c0_127 = arith.constant 0 : index
    %217 = vector.load %arg4[%c8_125, %c0_126, %c0_127] : memref<9x8x1xf32, #tpu.memory_space<vmem>>, vector<1x8x1xf32>
    %218 = vector.shape_cast %217 : vector<1x8x1xf32> to vector<8x1xf32>
    %219 = vector.broadcast %218 : vector<8x1xf32> to vector<8x512xf32>
    %220 = arith.addf %216, %219 : vector<8x512xf32>
    %cst_128 = arith.constant 0.000000e+00 : f32
    %221 = vector.broadcast %cst_128 : f32 to vector<8x512xf32>
    %222 = arith.maximumf %220, %221 : vector<8x512xf32>
    %223 = vector.extract_strided_slice %222 {offsets = [0, 0], sizes = [8, 256], strides = [1, 1]} : vector<8x512xf32> to vector<8x256xf32>
    %c0_129 = arith.constant 0 : index
    %c0_130 = arith.constant 0 : index
    %c0_131 = arith.constant 0 : index
    %224 = vector.load %arg5[%c0_129, %c0_130, %c0_131] : memref<2x8x256xf32, #tpu.memory_space<vmem>>, vector<1x8x256xf32>
    %225 = vector.shape_cast %224 : vector<1x8x256xf32> to vector<8x256xf32>
    %226 = vector.shape_cast %223 : vector<8x256xf32> to vector<1x8x256xf32>
    tpu.vector_store %arg5[%c0_129, %c0_130, %c0_131], %226 {strides = array<i32>} : memref<2x8x256xf32, #tpu.memory_space<vmem>>, vector<1x8x256xf32>,
    %227 = vector.extract_strided_slice %222 {offsets = [0, 256], sizes = [8, 256], strides = [1, 1]} : vector<8x512xf32> to vector<8x256xf32>
    %c1_132 = arith.constant 1 : index
    %c0_133 = arith.constant 0 : index
    %c0_134 = arith.constant 0 : index
    %228 = vector.load %arg5[%c1_132, %c0_133, %c0_134] : memref<2x8x256xf32, #tpu.memory_space<vmem>>, vector<1x8x256xf32>
    %229 = vector.shape_cast %228 : vector<1x8x256xf32> to vector<8x256xf32>
    %230 = vector.shape_cast %227 : vector<8x256xf32> to vector<1x8x256xf32>
    tpu.vector_store %arg5[%c1_132, %c0_133, %c0_134], %230 {strides = array<i32>} : memref<2x8x256xf32, #tpu.memory_space<vmem>>, vector<1x8x256xf32>,
    return
  }
  func.func @transform_0(%arg0: i32) -> (i32, i32, i32) {
    %c0_i32 = arith.constant 0 : i32
    %c0_i32_0 = arith.constant 0 : i32
    %c0_i32_1 = arith.constant 0 : i32
    %c0_i32_2 = arith.constant 0 : i32
    return %c0_i32, %c0_i32_0, %c0_i32_1 : i32, i32, i32
  }
  func.func @transform_1(%arg0: i32) -> (i32, i32, i32) {
    %c0_i32 = arith.constant 0 : i32
    %c0_i32_0 = arith.constant 0 : i32
    %c0_i32_1 = arith.constant 0 : i32
    %c0_i32_2 = arith.constant 0 : i32
    return %c0_i32, %c0_i32_0, %c0_i32_1 : i32, i32, i32
  }
  func.func @transform_2(%arg0: i32) -> (i32, i32, i32) {
    %c0_i32 = arith.constant 0 : i32
    %c0_i32_0 = arith.constant 0 : i32
    %c0_i32_1 = arith.constant 0 : i32
    %c0_i32_2 = arith.constant 0 : i32
    return %c0_i32, %c0_i32_0, %c0_i32_1 : i32, i32, i32
  }
  func.func @transform_3(%arg0: i32) -> (i32, i32, i32) {
    %c0_i32 = arith.constant 0 : i32
    %c0_i32_0 = arith.constant 0 : i32
    %c0_i32_1 = arith.constant 0 : i32
    %c0_i32_2 = arith.constant 0 : i32
    return %c0_i32, %c0_i32_0, %c0_i32_1 : i32, i32, i32
  }
  func.func @transform_4(%arg0: i32) -> (i32, i32, i32) {
    %c0_i32 = arith.constant 0 : i32
    %c0_i32_0 = arith.constant 0 : i32
    %c0_i32_1 = arith.constant 0 : i32
    %c0_i32_2 = arith.constant 0 : i32
    return %c0_i32, %c0_i32_0, %c0_i32_1 : i32, i32, i32
  }
}

</mosaic_0001>

<bundles_post_ra>
// kernel: ldgs_forward.1
= control target key start
LH: loop header
LB: loop body
LE: loop exit
PB: predicated region body
PF: predicated region fallthrough
CT: control target
= control target key end

     0   :  { %s2697_s19 = smov 17   ;;  %s2698_s24 = smov 16   ;;  %v4067_v4 = vmov 0.0   ;;  %v2705_v5 = vmov 0   ;;  %v24_v7 = vlaneseq  ;;  %vm350_vm8 = vcmask 588800   ;;  %s4062_s0 = inlined_call_operand.vmem [shape: f32[2,8,256], index: 0, kind: input, shape index: {}]   ;;  %s4063_s3 = inlined_call_operand.vmem [shape: f32[9,8,1], index: 3, kind: input, shape index: {}]   ;;  %s4064_s1 = inlined_call_operand.vmem [shape: f32[9,1,512], index: 1, kind: input, shape index: {}]   ;;  %s4065_s2 = inlined_call_operand.vmem [shape: f32[9,8,72], index: 2, kind: input, shape index: {}]   ;;  %s4066_s4 = inlined_call_operand.vmem [shape: f32[2,8,256], index: 4, kind: output, shape index: {}]  }
   0x1   :  { %v2735_v0 = vld [vmem:[%s4062_s0 + $0x10] sm:$0xff]  ;;  %v2740_v1 = vld [vmem:[%s4062_s0] sm:$0xff]  ;;  %v2749_v2 = vld [vmem:[%s4062_s0 + $0x18] sm:$0xff]  ;;  %s2700_s25 = smov 1   ;;  %s2701_s26 = smov 127   ;;  %418 = vmatprep.mubr.f32.mxu0 %v4067_v4  ;;  %489 = vmatprep.mubr.f32.mxu1 %v4067_v4  ;;  %vm795_vm9 = vcmask 130048  }
   0x2   :  { %210 = vrot.lane.b32.xlu1 %v2735_v0, %s2697_s19  ;;  %206 = vrot.lane.b32.xlu0 %v2740_v1, %s2697_s19  ;;  %v2754_v3 = vld [vmem:[%s4062_s0 + $0x8] sm:$0xff]  ;;  %s2699_s0 = smov 15   ;;  %s2702_s27 = smov 113   ;;  %v344_v6 = vld [vmem:[%s4063_s3] sm:$0xff]  ;;  %v25_v8 = vshrl.u32 %v24_v7, 7  ;;  %v2821_v11 = vand.u32 127, %v24_v7 }
   0x3   :  { %s2703_s28 = smov 112   ;;  %2695 = vset.pattern.permute.xlu0 %v2705_v5  ;;  %2696 = vset.pattern.permute.xlu1 %v2705_v5  ;;  %s2706_s29 = smov 111   ;;  %v22_v13 = vld [vmem:[%s4064_s1] sm:$0xf]  ;;  %v2418_v14 = vld [vmem:[%s4064_s1 + $0x4] sm:$0xf] }
   0x4   :  { %v2823_v12 = vsub.s32 1, %v25_v8  ;;  %vm216_vm0 = vcmp.lt.s32.totalorder %v2821_v11, 17  ;;  %v2832_v17 = vsub.s32 0, %v25_v8  ;;  %v2834_v18 = vsub.s32 3, %v25_v8  ;;  %v2419_v54 = vld [vmem:[%s4064_s1 + $0x8] sm:$0xf] }
   0x5   :  { %v2836_v19 = vsub.s32 2, %v25_v8  ;;  %vm233_vm1 = vcmp.lt.s32.totalorder %v2821_v11, 16  ;;  %v2420_v55 = vld [vmem:[%s4064_s1 + $0xc] sm:$0xf]  ;;  %vm250_vm2 = vcmp.lt.s32.totalorder %v2821_v11, 15  ;;  %vm267_vm3 = vcmp.lt.s32.totalorder %v2821_v11, 1 }
   0x6   :  { %212 = vrot.lane.b32.xlu1 %v2749_v2, %s2697_s19  ;;  %208 = vrot.lane.b32.xlu0 %v2754_v3, %s2697_s19  ;;  %v2840_v20 = vrot.slane %v22_v13, %v2823_v12  ;;  %v2843_v21 = vrot.slane %v2418_v14, %v2823_v12  ;;  %v2848_v25 = vrot.slane %v22_v13, %v2832_v17  ;;  %vm284_vm4 = vcmp.lt.s32.totalorder %v2821_v11, 127 }
   0x7   :  { %v2851_v26 = vrot.slane %v2418_v14, %v2832_v17  ;;  %v2854_v27 = vrot.slane %v22_v13, %v2834_v18  ;;  %v2861_v30 = vrot.slane %v2418_v14, %v2834_v18  ;;  %v2864_v31 = vrot.slane %v22_v13, %v2836_v19 }
   0x8   :  { %v2871_v35 = vrot.slane %v2418_v14, %v2836_v19  ;;  %v2896_v58 = vrot.slane %v2419_v54, %v2823_v12  ;;  %v2899_v59 = vrot.slane %v2420_v55, %v2823_v12  ;;  %v2904_v61 = vrot.slane %v2419_v54, %v2832_v17 }
   0x9   :  { %v2907_v62 = vrot.slane %v2419_v54, %v2836_v19  ;;  %v2910_v63 = vrot.slane %v2419_v54, %v2834_v18  ;;  %vm318_vm5 = vcmp.lt.s32.totalorder %v2821_v11, 112  ;;  %vm301_vm6 = vcmp.lt.s32.totalorder %v2821_v11, 113 }
   0xa   :  { %227 = vrot.lane.b32.xlu1 %v2754_v3, %s2698_s24  ;;  %225 = vrot.lane.b32.xlu0 %v2740_v1, %s2698_s24  ;;  %4075 = vst [vmem:[#allocation2_spill] sm:$0xff] %v2871_v35  ;;  %vm335_vm7 = vcmp.lt.s32.totalorder %v2821_v11, 111  ;;  %vm1526_vm10 = vcmask 195584   ;;  %vm2257_vm11 = vcmask 261120  }
   0xe   :  { %231 = vrot.lane.b32.xlu1 %v2749_v2, %s2698_s24  ;;  %229 = vrot.lane.b32.xlu0 %v2735_v0, %s2698_s24 }
  0x12   :  { %244 = vrot.lane.b32.xlu1 %v2754_v3, %s2699_s0  ;;  %242 = vrot.lane.b32.xlu0 %v2740_v1, %s2699_s0 }
  0x16   :  { %248 = vrot.lane.b32.xlu1 %v2749_v2, %s2699_s0  ;;  %246 = vrot.lane.b32.xlu0 %v2735_v0, %s2699_s0 }
  0x1a   :  { %261 = vrot.lane.b32.xlu1 %v2754_v3, %s2700_s25  ;;  %259 = vrot.lane.b32.xlu0 %v2740_v1, %s2700_s25 }
  0x1e   :  { %265 = vrot.lane.b32.xlu1 %v2749_v2, %s2700_s25  ;;  %263 = vrot.lane.b32.xlu0 %v2735_v0, %s2700_s25 }
  0x22   :  { %278 = vrot.lane.b32.xlu1 %v2754_v3, %s2701_s26  ;;  %276 = vrot.lane.b32.xlu0 %v2740_v1, %s2701_s26 }
  0x26   :  { %282 = vrot.lane.b32.xlu1 %v2749_v2, %s2701_s26  ;;  %280 = vrot.lane.b32.xlu0 %v2735_v0, %s2701_s26 }
  0x2a   :  { %295 = vrot.lane.b32.xlu1 %v2754_v3, %s2702_s27  ;;  %293 = vrot.lane.b32.xlu0 %v2740_v1, %s2702_s27 }
  0x2e   :  { %299 = vrot.lane.b32.xlu1 %v2749_v2, %s2702_s27  ;;  %297 = vrot.lane.b32.xlu0 %v2735_v0, %s2702_s27 }
  0x32   :  { %312 = vrot.lane.b32.xlu1 %v2754_v3, %s2703_s28  ;;  %310 = vrot.lane.b32.xlu0 %v2740_v1, %s2703_s28 }
  0x36   :  { %316 = vrot.lane.b32.xlu1 %v2749_v2, %s2703_s28  ;;  %314 = vrot.lane.b32.xlu0 %v2735_v0, %s2703_s28 }
  0x3a   :  { %329 = vrot.lane.b32.xlu1 %v2754_v3, %s2706_s29  ;;  %327 = vrot.lane.b32.xlu0 %v2740_v1, %s2706_s29 }
  0x3e   :  { %333 = vrot.lane.b32.xlu1 %v2749_v2, %s2706_s29  ;;  %331 = vrot.lane.b32.xlu0 %v2735_v0, %s2706_s29 }
  0x42   :  { %347 = vperm.xlu0 %2695, %v344_v6  }
  0x74   :  { %v211_v9 = vpop.permute.xlu1 %210  ;;  %v207_v10 = vpop.permute.xlu0 %206 }
  0x78   :  { %v213_v15 = vpop.permute.xlu1 %212  ;;  %v209_v16 = vpop.permute.xlu0 %208 }
  0x79   :  { %v219_v22 = vsel %vm216_vm0, %v207_v10, %v209_v16  ;;  %v220_v28 = vsel %vm216_vm0, %v213_v15, %v207_v10  ;;  %v217_v34 = vsel %vm216_vm0, %v211_v9, %v213_v15  ;;  %v218_v36 = vsel %vm216_vm0, %v209_v16, %v211_v9 }
  0x7a   :  { %v222_v32 = vmul.f32 %v219_v22, %v2840_v20  ;;  %v221_v40 = vmul.f32 %v220_v28, %v2848_v25  ;;  %v224_v43 = vmul.f32 %v217_v34, %v2854_v27  ;;  %v223_v47 = vmul.f32 %v218_v36, %v2864_v31 }
  0x7b   :  { %v2917_v9 = vrot.slane %v2420_v55, %v2832_v17  ;;  %v2920_v10 = vrot.slane %v2420_v55, %v2836_v19  ;;  %v2927_v16 = vrot.slane %v2420_v55, %v2834_v18 }
  0x7c   :  { %v228_v23 = vpop.permute.xlu1 %227  ;;  %v226_v24 = vpop.permute.xlu0 %225 }
  0x7d   :  { %v236_v29 = vsel %vm233_vm1, %v226_v24, %v228_v23 }
  0x7e   :  { %v239_v33 = vmul.f32 %v236_v29, %v2843_v21 }
  0x80   :  { %v232_v37 = vpop.permute.xlu1 %231  ;;  %v230_v38 = vpop.permute.xlu0 %229  ;;  %v2461_v39 = vpack.c.bf16 %v239_v33, %v222_v32 }
  0x81   :  { %v237_v41 = vsel %vm233_vm1, %v232_v37, %v226_v24  ;;  %v235_v42 = vsel %vm233_vm1, %v228_v23, %v230_v38  ;;  %v234_v44 = vsel %vm233_vm1, %v230_v38, %v232_v37 }
  0x82   :  { %2462 = vmatprep.subr.bf16.mxu0 %v2461_v39  ;;  %v238_v45 = vmul.f32 %v237_v41, %v2851_v26  ;;  %v241_v46 = vmul.f32 %v234_v44, %v2861_v30  ;;  %v240_v48 = vmul.f32 %v235_v42, %v2871_v35  ;;  %v2421_v41 = vld [vmem:[%s4064_s1 + $0x14] sm:$0xf] }
  0x84   :  { %v245_v49 = vpop.permute.xlu1 %244  ;;  %v243_v50 = vpop.permute.xlu0 %242  ;;  %v2463_v51 = vpack.c.bf16 %v238_v45, %v221_v40  ;;  %v2477_v52 = vpack.c.bf16 %v241_v46, %v224_v43  ;;  %v2479_v53 = vpack.c.bf16 %v240_v48, %v223_v47  ;;  %v2948_v47 = vrot.slane %v2421_v41, %v2832_v17 }
  0x85   :  { %v253_v60 = vsel %vm250_vm2, %v243_v50, %v245_v49  ;;  %v2951_v48 = vrot.slane %v2421_v41, %v2834_v18 }
  0x86   :  { %2464 = vmatpush1.bf16.msra.mxu0 %v2463_v51  ;;  %2478 = vmatprep.subr.bf16.mxu1 %v2477_v52  ;;  %v256_v13 = vmul.f32 %v253_v60, %v2896_v58  ;;  %v2959_v51 = vrot.slane %v2421_v41, %v2836_v19 }
  0x87   :  { %2480 = vmatpush1.bf16.msra.mxu1 %v2479_v53 }
  0x88   :  { %v249_v56 = vpop.permute.xlu1 %248  ;;  %v247_v57 = vpop.permute.xlu0 %246 }
  0x89   :  { %v254_v7 = vsel %vm250_vm2, %v249_v56, %v243_v50  ;;  %v252_v14 = vsel %vm250_vm2, %v245_v49, %v247_v57  ;;  %v251_v22 = vsel %vm250_vm2, %v247_v57, %v249_v56  ;;  %v2956_v50 = vrot.slane %v2421_v41, %v2823_v12 }
  0x8a   :  { %v255_v23 = vmul.f32 %v254_v7, %v2904_v61  ;;  %v257_v32 = vmul.f32 %v252_v14, %v2907_v62  ;;  %v258_v37 = vmul.f32 %v251_v22, %v2910_v63 }
  0x8c   :  { %v262_v5 = vpop.permute.xlu1 %261  ;;  %v260_v6 = vpop.permute.xlu0 %259 }
  0x8d   :  { %v270_v8 = vsel %vm267_vm3, %v260_v6, %v262_v5 }
  0x8e   :  { %v273_v15 = vmul.f32 %v270_v8, %v2899_v59 }
  0x90   :  { %v266_v24 = vpop.permute.xlu1 %265  ;;  %v264_v28 = vpop.permute.xlu0 %263  ;;  %v2465_v29 = vpack.c.bf16 %v273_v15, %v256_v13 }
  0x91   :  { %v271_v33 = vsel %vm267_vm3, %v266_v24, %v260_v6  ;;  %v268_v34 = vsel %vm267_vm3, %v264_v28, %v266_v24  ;;  %v269_v36 = vsel %vm267_vm3, %v262_v5, %v264_v28  ;;  %v2423_v28 = vld [vmem:[%s4064_s1 + $0x1c] sm:$0xf] }
  0x92   :  { %v272_v38 = vmul.f32 %v271_v33, %v2917_v9  ;;  %v274_v39 = vmul.f32 %v269_v36, %v2920_v10  ;;  %v275_v40 = vmul.f32 %v268_v34, %v2927_v16  ;;  %2466 = vmatprep.subr.bf16.mxu0 %v2465_v29  ;;  %v2422_v29 = vld [vmem:[%s4064_s1 + $0x18] sm:$0xf] }
  0x93   :  { %v2987_v33 = vrot.slane %v2422_v29, %v2823_v12 }
  0x94   :  { %v279_v42 = vpop.permute.xlu1 %278  ;;  %v277_v43 = vpop.permute.xlu0 %276  ;;  %v2467_v44 = vpack.c.bf16 %v272_v38, %v255_v23  ;;  %v2481_v45 = vpack.c.bf16 %v275_v40, %v258_v37  ;;  %v2483_v46 = vpack.c.bf16 %v274_v39, %v257_v32  ;;  %v2984_v32 = vrot.slane %v2422_v29, %v2834_v18 }
  0x95   :  { %v287_v49 = vsel %vm284_vm4, %v277_v43, %v279_v42  ;;  %v2992_v38 = vrot.slane %v2422_v29, %v2836_v19  ;;  %v2997_v40 = vrot.slane %v2423_v28, %v2832_v17 }
  0x96   :  { %2468 = vmatpush1.bf16.msra.mxu0 %v2467_v44  ;;  %2482 = vmatprep.subr.bf16.mxu1 %v2481_v45  ;;  %v289_v54 = vmul.f32 %v287_v49, %v2948_v47  ;;  %v3008_v44 = vrot.slane %v2423_v28, %v2836_v19  ;;  %v3011_v45 = vrot.slane %v2422_v29, %v2832_v17  ;;  %v2424_v29 = vld [vmem:[%s4064_s1 + $0x20] sm:$0xf] }
  0x97   :  { %2484 = vmatpush1.bf16.msra.mxu1 %v2483_v46 }
  0x98   :  { %v283_v52 = vpop.permute.xlu1 %282  ;;  %v281_v53 = vpop.permute.xlu0 %280  ;;  %v2471_v22 = vpack.c.bf16 %v289_v54, %v2740_v1 }
  0x99   :  { %v288_v55 = vsel %vm284_vm4, %v283_v52, %v277_v43  ;;  %v285_v56 = vsel %vm284_vm4, %v281_v53, %v283_v52  ;;  %v286_v57 = vsel %vm284_vm4, %v279_v42, %v281_v53  ;;  %v3002_v42 = vrot.slane %v2423_v28, %v2834_v18 }
  0x9a   :  { %v292_v60 = vmul.f32 %v288_v55, %v2951_v48  ;;  %v290_v5 = vmul.f32 %v286_v57, %v2956_v50  ;;  %v291_v6 = vmul.f32 %v285_v56, %v2959_v51  ;;  %v3005_v43 = vrot.slane %v2423_v28, %v2823_v12 }
  0x9c   :  { %v296_v7 = vpop.permute.xlu1 %295  ;;  %v294_v8 = vpop.permute.xlu0 %293  ;;  %v2469_v13 = vpack.c.bf16 %v290_v5, %v2754_v3  ;;  %v2485_v14 = vpack.c.bf16 %v292_v60, %v2749_v2  ;;  %v2487_v15 = vpack.c.bf16 %v291_v6, %v2735_v0 }
  0x9d   :  { %v304_v49 = vsel %vm301_vm6, %v294_v8, %v296_v7 }
  0x9e   :  { %2470 = vmatprep.subr.bf16.mxu0 %v2469_v13  ;;  %2486 = vmatprep.subr.bf16.mxu1 %v2485_v14  ;;  %v306_v14 = vmul.f32 %v304_v49, %v3011_v45 }
  0x9f   :  { %2472 = vmatpush1.bf16.msra.mxu0 %v2471_v22  ;;  %2488 = vmatpush1.bf16.msra.mxu1 %v2487_v15 }
  0xa0   :  { %v300_v23 = vpop.permute.xlu1 %299  ;;  %v298_v24 = vpop.permute.xlu0 %297 }
  0xa1   :  { %v305_v37 = vsel %vm301_vm6, %v300_v23, %v294_v8  ;;  %v303_v39 = vsel %vm301_vm6, %v296_v7, %v298_v24  ;;  %v302_v46 = vsel %vm301_vm6, %v298_v24, %v300_v23 }
  0xa2   :  { %v309_v52 = vmul.f32 %v305_v37, %v2984_v32  ;;  %v307_v53 = vmul.f32 %v303_v39, %v2987_v33  ;;  %v308_v6 = vmul.f32 %v302_v46, %v2992_v38  ;;  %v3039_v37 = vrot.slane %v2424_v29, %v2834_v18 }
  0xa3   :  { %v3042_v39 = vrot.slane %v2424_v29, %v2836_v19 }
  0xa4   :  { %v313_v34 = vpop.permute.xlu1 %312  ;;  %v311_v36 = vpop.permute.xlu0 %310 }
  0xa5   :  { %v321_v41 = vsel %vm318_vm5, %v311_v36, %v313_v34 }
  0xa6   :  { %v323_v56 = vmul.f32 %v321_v41, %v2997_v40  ;;  %v3045_v41 = vrot.slane %v2424_v29, %v2832_v17 }
  0xa8   :  { %v317_v54 = vpop.permute.xlu1 %316  ;;  %v315_v55 = vpop.permute.xlu0 %314 }
  0xa9   :  { %v322_v57 = vsel %vm318_vm5, %v317_v54, %v311_v36  ;;  %v319_v60 = vsel %vm318_vm5, %v315_v55, %v317_v54  ;;  %v320_v5 = vsel %vm318_vm5, %v313_v34, %v315_v55  ;;  %v2475_v34 = vpack.c.bf16 %v323_v56, %v306_v14  ;;  %v205_v56 = vld [vmem:[%s4065_s2] sm:$0xff] }
  0xaa   :  { %v326_v7 = vmul.f32 %v322_v57, %v3002_v42  ;;  %v324_v8 = vmul.f32 %v320_v5, %v3005_v43  ;;  %v325_v13 = vmul.f32 %v319_v60, %v3008_v44  ;;  %v3036_v36 = vrot.slane %v2424_v29, %v2823_v12  ;;  %v2428_v29 = vld [vmem:[%s4063_s3 + $0x8] sm:$0xff] }
  0xac   :  { %v330_v15 = vpop.permute.xlu1 %329  ;;  %v328_v22 = vpop.permute.xlu0 %327  ;;  %v2473_v23 = vpack.c.bf16 %v324_v8, %v307_v53  ;;  %v2489_v24 = vpack.c.bf16 %v326_v7, %v309_v52  ;;  %v2491_v28 = vpack.c.bf16 %v325_v13, %v308_v6 }
  0xad   :  { %v338_v46 = vsel %vm335_vm7, %v328_v22, %v330_v15 }
  0xae   :  { %2474 = vmatprep.subr.bf16.mxu0 %v2473_v23  ;;  %2490 = vmatprep.subr.bf16.mxu1 %v2489_v24  ;;  %v340_v55 = vmul.f32 %v338_v46, %v3045_v41 }
  0xaf   :  { %2476 = vmatpush1.bf16.msra.mxu0 %v2475_v34  ;;  %2492 = vmatpush1.bf16.msra.mxu1 %v2491_v28 }
  0xb0   :  { %v334_v49 = vpop.permute.xlu1 %333  ;;  %v332_v52 = vpop.permute.xlu0 %331 }
  0xb1   :  { %v339_v12 = vsel %vm335_vm7, %v334_v49, %v328_v22  ;;  %v336_v18 = vsel %vm335_vm7, %v332_v52, %v334_v49  ;;  %v337_v19 = vsel %vm335_vm7, %v330_v15, %v332_v52 }
  0xb2   :  { %v341_v53 = vmul.f32 %v337_v19, %v3036_v36  ;;  %v343_v54 = vmul.f32 %v339_v12, %v3039_v37  ;;  %v342_v17 = vmul.f32 %v336_v18, %v3042_v39 }
  0xb4   :  { %370 = vmatprep.subr.mxu0 %v341_v53  ;;  %441 = vmatprep.subr.mxu1 %v343_v54 }
  0xb5   :  { %371 = vmatpush1.msra.mxu0 %v340_v55  ;;  %442 = vmatpush1.msra.mxu1 %v342_v17 }
  0xb6   :  { %2425 = vmatmul.mubr.msk.f32.vlgmr.msra.gmra.mrb[0].mxu0 %vm350_vm8, %v205_v56  ;;  %2426 = vmatmul.mubr.msk.f32.vlgmr.msra.gmra.mrb[0].mxu1 %vm350_vm8, %v205_v56 }
  0xb7   :  { %704 = vmatprep.mubr.f32.mxu0 %v4067_v4  ;;  %775 = vmatprep.mubr.f32.mxu1 %v4067_v4 }
  0xc1   :  { %v348_v57 = vpop.permute.xlu0 %347 }
 0x189   :  { %v420_v60 = vpop.f32.mrb[0].mxu0  ;;  %v491_v5 = vpop.f32.mrb[0].mxu1 }
 0x18a   :  { %v421_v6 = vadd.f32 %v420_v60, %v348_v57  ;;  %v492_v7 = vadd.f32 %v491_v5, %v348_v57  ;;  %v422_v8 = vpop.f32.mrb[1].mxu0  ;;  %v493_v13 = vpop.f32.mrb[1].mxu1 }
 0x18b   :  { %v423_v22 = vadd.f32 %v422_v8, %v348_v57  ;;  %v494_v24 = vadd.f32 %v493_v13, %v348_v57 }
 0x18c   :  { %v3066_v14 = vmax.f32 %v421_v6, 0.0  ;;  %v3068_v15 = vmax.f32 %v492_v7, 0.0 }
 0x18d   :  { %v3074_v23 = vmax.f32 %v423_v22, 0.0  ;;  %v3080_v28 = vmax.f32 %v494_v24, 0.0 }
 0x18e   :  { %506 = vrot.lane.b32.xlu0 %v3068_v15, %s2697_s19  ;;  %502 = vrot.lane.b32.xlu1 %v3066_v14, %s2697_s19 }
 0x192   :  { %518 = vrot.lane.b32.xlu0 %v3066_v14, %s2698_s24  ;;  %504 = vrot.lane.b32.xlu1 %v3074_v23, %s2697_s19 }
 0x196   :  { %522 = vrot.lane.b32.xlu0 %v3068_v15, %s2698_s24  ;;  %508 = vrot.lane.b32.xlu1 %v3080_v28, %s2697_s19 }
 0x19a   :  { %534 = vrot.lane.b32.xlu0 %v3066_v14, %s2699_s0  ;;  %520 = vrot.lane.b32.xlu1 %v3074_v23, %s2698_s24 }
 0x19e   :  { %538 = vrot.lane.b32.xlu0 %v3068_v15, %s2699_s0  ;;  %524 = vrot.lane.b32.xlu1 %v3080_v28, %s2698_s24 }
 0x1a2   :  { %550 = vrot.lane.b32.xlu0 %v3066_v14, %s2700_s25  ;;  %536 = vrot.lane.b32.xlu1 %v3074_v23, %s2699_s0 }
 0x1a6   :  { %554 = vrot.lane.b32.xlu0 %v3068_v15, %s2700_s25  ;;  %540 = vrot.lane.b32.xlu1 %v3080_v28, %s2699_s0 }
 0x1aa   :  { %566 = vrot.lane.b32.xlu0 %v3066_v14, %s2701_s26  ;;  %552 = vrot.lane.b32.xlu1 %v3074_v23, %s2700_s25 }
 0x1ae   :  { %570 = vrot.lane.b32.xlu0 %v3068_v15, %s2701_s26  ;;  %556 = vrot.lane.b32.xlu1 %v3080_v28, %s2700_s25 }
 0x1b2   :  { %582 = vrot.lane.b32.xlu0 %v3066_v14, %s2702_s27  ;;  %568 = vrot.lane.b32.xlu1 %v3074_v23, %s2701_s26 }
 0x1b6   :  { %586 = vrot.lane.b32.xlu0 %v3068_v15, %s2702_s27  ;;  %572 = vrot.lane.b32.xlu1 %v3080_v28, %s2701_s26 }
 0x1ba   :  { %598 = vrot.lane.b32.xlu0 %v3066_v14, %s2703_s28  ;;  %584 = vrot.lane.b32.xlu1 %v3074_v23, %s2702_s27 }
 0x1be   :  { %602 = vrot.lane.b32.xlu0 %v3068_v15, %s2703_s28  ;;  %588 = vrot.lane.b32.xlu1 %v3080_v28, %s2702_s27 }
 0x1c2   :  { %614 = vrot.lane.b32.xlu0 %v3066_v14, %s2706_s29  ;;  %600 = vrot.lane.b32.xlu1 %v3074_v23, %s2703_s28 }
 0x1c6   :  { %618 = vrot.lane.b32.xlu0 %v3068_v15, %s2706_s29  ;;  %604 = vrot.lane.b32.xlu1 %v3080_v28, %s2703_s28 }
 0x1ca   :  { %634 = vperm.xlu0 %2695, %v2428_v29   ;;  %616 = vrot.lane.b32.xlu1 %v3074_v23, %s2706_s29 }
 0x1ce   :  { %620 = vrot.lane.b32.xlu1 %v3080_v28, %s2706_s29 }
 0x200   :  { %v507_v34 = vpop.permute.xlu0 %506  ;;  %v503_v46 = vpop.permute.xlu1 %502 }
 0x204   :  { %v519_v49 = vpop.permute.xlu0 %518  ;;  %v505_v52 = vpop.permute.xlu1 %504 }
 0x205   :  { %v512_v19 = vsel %vm216_vm0, %v503_v46, %v505_v52  ;;  %v511_v6 = vsel %vm216_vm0, %v505_v52, %v507_v34 }
 0x206   :  { %v515_v55 = vmul.f32 %v512_v19, %v2840_v20 }
 0x208   :  { %v523_v12 = vpop.permute.xlu0 %522  ;;  %v509_v18 = vpop.permute.xlu1 %508 }
 0x209   :  { %v510_v60 = vsel %vm216_vm0, %v507_v34, %v509_v18  ;;  %v513_v5 = vsel %vm216_vm0, %v509_v18, %v503_v46  ;;  %v516_v34 = vmul.f32 %v511_v6, %v2864_v31 }
 0x20a   :  { %v514_v19 = vmul.f32 %v513_v5, %v2848_v25 }
 0x20c   :  { %v535_v53 = vpop.permute.xlu0 %534  ;;  %v521_v54 = vpop.permute.xlu1 %520 }
 0x20d   :  { %v528_v17 = vsel %vm233_vm1, %v519_v49, %v521_v54  ;;  %v527_v56 = vsel %vm233_vm1, %v521_v54, %v523_v12  ;;  %v517_v54 = vmul.f32 %v510_v60, %v2854_v27 }
 0x20e   :  { %v531_v57 = vmul.f32 %v528_v17, %v2843_v21  ;;  %v532_v22 = vmul.f32 %v527_v56, %v2871_v35 }
 0x210   :  { %v539_v7 = vpop.permute.xlu0 %538  ;;  %v525_v8 = vpop.permute.xlu1 %524  ;;  %v2493_v13 = vpack.c.bf16 %v531_v57, %v515_v55  ;;  %v2511_v57 = vpack.c.bf16 %v532_v22, %v516_v34 }
 0x211   :  { %v526_v24 = vsel %vm233_vm1, %v523_v12, %v525_v8  ;;  %v529_v29 = vsel %vm233_vm1, %v525_v8, %v519_v49 }
 0x212   :  { %v530_v46 = vmul.f32 %v529_v29, %v2851_v26  ;;  %v533_v18 = vmul.f32 %v526_v24, %v2861_v30  ;;  %2494 = vmatprep.subr.bf16.mxu0 %v2493_v13 }
 0x214   :  { %v2495_v52 = vpack.c.bf16 %v530_v46, %v514_v19  ;;  %v551_v17 = vpop.permute.xlu0 %550  ;;  %v537_v55 = vpop.permute.xlu1 %536  ;;  %v2509_v56 = vpack.c.bf16 %v533_v18, %v517_v54 }
 0x215   :  { %v544_v60 = vsel %vm250_vm2, %v535_v53, %v537_v55  ;;  %v543_v54 = vsel %vm250_vm2, %v537_v55, %v539_v7 }
 0x216   :  { %2496 = vmatpush1.bf16.msra.mxu0 %v2495_v52  ;;  %2510 = vmatprep.subr.bf16.mxu1 %v2509_v56  ;;  %v547_v6 = vmul.f32 %v544_v60, %v2896_v58 }
 0x217   :  { %2512 = vmatpush1.bf16.msra.mxu1 %v2511_v57 }
 0x218   :  { %v555_v49 = vpop.permute.xlu0 %554  ;;  %v541_v12 = vpop.permute.xlu1 %540 }
 0x219   :  { %v542_v29 = vsel %vm250_vm2, %v539_v7, %v541_v12  ;;  %v545_v19 = vsel %vm250_vm2, %v541_v12, %v535_v53  ;;  %v548_v7 = vmul.f32 %v543_v54, %v2907_v62 }
 0x21a   :  { %v546_v60 = vmul.f32 %v545_v19, %v2904_v61 }
 0x21c   :  { %v567_v5 = vpop.permute.xlu0 %566  ;;  %v553_v8 = vpop.permute.xlu1 %552 }
 0x21d   :  { %v560_v13 = vsel %vm267_vm3, %v551_v17, %v553_v8  ;;  %v559_v24 = vsel %vm267_vm3, %v553_v8, %v555_v49  ;;  %v549_v8 = vmul.f32 %v542_v29, %v2910_v63 }
 0x21e   :  { %v563_v22 = vmul.f32 %v560_v13, %v2899_v59  ;;  %v564_v52 = vmul.f32 %v559_v24, %v2920_v10 }
 0x220   :  { %v571_v46 = vpop.permute.xlu0 %570  ;;  %v557_v18 = vpop.permute.xlu1 %556  ;;  %v2497_v34 = vpack.c.bf16 %v563_v22, %v547_v6  ;;  %v2515_v22 = vpack.c.bf16 %v564_v52, %v548_v7 }
 0x221   :  { %v558_v56 = vsel %vm267_vm3, %v555_v49, %v557_v18  ;;  %v561_v57 = vsel %vm267_vm3, %v557_v18, %v551_v17 }
 0x222   :  { %v562_v53 = vmul.f32 %v561_v57, %v2917_v9  ;;  %v565_v12 = vmul.f32 %v558_v56, %v2927_v16  ;;  %2498 = vmatprep.subr.bf16.mxu0 %v2497_v34 }
 0x224   :  { %v2499_v55 = vpack.c.bf16 %v562_v53, %v546_v60  ;;  %v583_v13 = vpop.permute.xlu0 %582  ;;  %v569_v6 = vpop.permute.xlu1 %568  ;;  %v2513_v24 = vpack.c.bf16 %v565_v12, %v549_v8 }
 0x225   :  { %v575_v49 = vsel %vm284_vm4, %v569_v6, %v571_v46  ;;  %v576_v17 = vsel %vm284_vm4, %v567_v5, %v569_v6 }
 0x226   :  { %v578_v29 = vmul.f32 %v576_v17, %v2948_v47  ;;  %v579_v19 = vmul.f32 %v575_v49, %v2956_v50  ;;  %2500 = vmatpush1.bf16.msra.mxu0 %v2499_v55  ;;  %2514 = vmatprep.subr.bf16.mxu1 %v2513_v24 }
 0x227   :  { %2516 = vmatpush1.bf16.msra.mxu1 %v2515_v22 }
 0x228   :  { %v2503_v54 = vpack.c.bf16 %v578_v29, %v3066_v14  ;;  %v587_v18 = vpop.permute.xlu0 %586  ;;  %v573_v34 = vpop.permute.xlu1 %572  ;;  %v2501_v56 = vpack.c.bf16 %v579_v19, %v3074_v23 }
 0x229   :  { %v574_v52 = vsel %vm284_vm4, %v571_v46, %v573_v34  ;;  %v577_v57 = vsel %vm284_vm4, %v573_v34, %v567_v5 }
 0x22a   :  { %v580_v60 = vmul.f32 %v574_v52, %v2959_v51  ;;  %v581_v8 = vmul.f32 %v577_v57, %v2951_v48  ;;  %2502 = vmatprep.subr.bf16.mxu0 %v2501_v56 }
 0x22b   :  { %2504 = vmatpush1.bf16.msra.mxu0 %v2503_v54 }
 0x22c   :  { %v2519_v53 = vpack.c.bf16 %v580_v60, %v3068_v15  ;;  %v599_v12 = vpop.permute.xlu0 %598  ;;  %v585_v14 = vpop.permute.xlu1 %584  ;;  %v2517_v7 = vpack.c.bf16 %v581_v8, %v3080_v28 }
 0x22d   :  { %v591_v46 = vsel %vm301_vm6, %v585_v14, %v587_v18  ;;  %v592_v5 = vsel %vm301_vm6, %v583_v13, %v585_v14 }
 0x22e   :  { %2518 = vmatprep.subr.bf16.mxu1 %v2517_v7  ;;  %v594_v22 = vmul.f32 %v592_v5, %v3011_v45  ;;  %v595_v28 = vmul.f32 %v591_v46, %v2987_v33 }
 0x22f   :  { %2520 = vmatpush1.bf16.msra.mxu1 %v2519_v53 }
 0x230   :  { %v603_v23 = vpop.permute.xlu0 %602  ;;  %v589_v55 = vpop.permute.xlu1 %588 }
 0x231   :  { %v590_v19 = vsel %vm301_vm6, %v587_v18, %v589_v55  ;;  %v593_v54 = vsel %vm301_vm6, %v589_v55, %v583_v13 }
 0x232   :  { %v596_v8 = vmul.f32 %v590_v19, %v2992_v38  ;;  %v597_v53 = vmul.f32 %v593_v54, %v2984_v32  ;;  %v2432_v19 = vld [vmem:[%s4063_s3 + $0x30] sm:$0xff] }
 0x233   :  { %792 = vperm.xlu1 %2696, %v2432_v19  }
 0x234   :  { %v601_v6 = vpop.permute.xlu1 %600  ;;  %v615_v49 = vpop.permute.xlu0 %614 }
 0x235   :  { %v607_v24 = vsel %vm318_vm5, %v601_v6, %v603_v23  ;;  %v608_v15 = vsel %vm318_vm5, %v599_v12, %v601_v6 }
 0x236   :  { %v610_v17 = vmul.f32 %v608_v15, %v2997_v40  ;;  %v611_v29 = vmul.f32 %v607_v24, %v3005_v43  ;;  %v2427_v24 = vld [vmem:[%s4065_s2 + $0x8] sm:$0xff] }
 0x238   :  { %v2507_v34 = vpack.c.bf16 %v610_v17, %v594_v22  ;;  %v605_v56 = vpop.permute.xlu1 %604  ;;  %v2505_v52 = vpack.c.bf16 %v611_v29, %v595_v28  ;;  %v619_v13 = vpop.permute.xlu0 %618 }
 0x239   :  { %v606_v57 = vsel %vm318_vm5, %v603_v23, %v605_v56  ;;  %v609_v60 = vsel %vm318_vm5, %v605_v56, %v599_v12 }
 0x23a   :  { %v612_v14 = vmul.f32 %v606_v57, %v3008_v44  ;;  %v613_v18 = vmul.f32 %v609_v60, %v3002_v42  ;;  %2506 = vmatprep.subr.bf16.mxu0 %v2505_v52 }
 0x23b   :  { %2508 = vmatpush1.bf16.msra.mxu0 %v2507_v34 }
 0x23c   :  { %v2523_v7 = vpack.c.bf16 %v612_v14, %v596_v8  ;;  %v617_v55 = vpop.permute.xlu1 %616  ;;  %v2521_v46 = vpack.c.bf16 %v613_v18, %v597_v53 }
 0x23d   :  { %v623_v23 = vsel %vm335_vm7, %v617_v55, %v619_v13  ;;  %v624_v12 = vsel %vm335_vm7, %v615_v49, %v617_v55 }
 0x23e   :  { %v626_v5 = vmul.f32 %v624_v12, %v3045_v41  ;;  %2522 = vmatprep.subr.bf16.mxu1 %v2521_v46  ;;  %v627_v6 = vmul.f32 %v623_v23, %v3036_v36  ;;  %v2431_v23 = vld [vmem:[%s4065_s2 + $0x30] sm:$0xff] }
 0x23f   :  { %2524 = vmatpush1.bf16.msra.mxu1 %v2523_v7 }
 0x240   :  { %656 = vmatprep.subr.mxu0 %v627_v6  ;;  %v621_v15 = vpop.permute.xlu1 %620 }
 0x241   :  { %v622_v22 = vsel %vm335_vm7, %v619_v13, %v621_v15  ;;  %v625_v28 = vsel %vm335_vm7, %v621_v15, %v615_v49  ;;  %657 = vmatpush1.msra.mxu0 %v626_v5 }
 0x242   :  { %v628_v17 = vmul.f32 %v622_v22, %v3042_v39  ;;  %2429 = vmatmul.mubr.msk.f32.vlgmr.msra.gmra.mrb[2].mxu0 %vm350_vm8, %v2427_v24  ;;  %v629_v29 = vmul.f32 %v625_v28, %v3039_v37 }
 0x243   :  { %863 = vmatprep.mubr.f32.mxu0 %v4067_v4 }
 0x244   :  { %727 = vmatprep.subr.mxu1 %v629_v29 }
 0x245   :  { %728 = vmatpush1.msra.mxu1 %v628_v17 }
 0x246   :  { %2430 = vmatmul.mubr.msk.f32.vlgmr.msra.gmra.mrb[2].mxu1 %vm350_vm8, %v2427_v24 }
 0x247   :  { %934 = vmatprep.mubr.f32.mxu1 %v4067_v4 }
 0x249   :  { %v635_v49 = vpop.permute.xlu0 %634 }
 0x315   :  { %v706_v54 = vpop.f32.mrb[2].mxu0 }
 0x316   :  { %v707_v34 = vadd.f32 %v706_v54, %v635_v49  ;;  %v708_v56 = vpop.f32.mrb[3].mxu0  ;;  %v2436_v54 = vld [vmem:[%s4063_s3 + $0x10] sm:$0xff] }
 0x317   :  { %v709_v52 = vadd.f32 %v708_v56, %v635_v49 }
 0x318   :  { %v782_v57 = vadd.f32 %v707_v34, %v2740_v1 }
 0x319   :  { %v783_v60 = vadd.f32 %v709_v52, %v2754_v3  ;;  %v777_v8 = vpop.f32.mrb[2].mxu1 }
 0x31a   :  { %v778_v53 = vadd.f32 %v777_v8, %v635_v49  ;;  %v779_v14 = vpop.f32.mrb[3].mxu1  ;;  %v3257_v7 = vpack.c.bf16 %v782_v57, %v2740_v1  ;;  %v793_v1 = vpop.permute.xlu1 %792 }
 0x31b   :  { %v780_v18 = vadd.f32 %v779_v14, %v635_v49  ;;  %v3254_v13 = vpack.c.bf16 %v783_v60, %v2754_v3 }
 0x31c   :  { %v784_v55 = vadd.f32 %v2735_v0, %v778_v53 }
 0x31d   :  { %v785_v46 = vadd.f32 %v2749_v2, %v780_v18  ;;  %2526 = vmatprep.subr.bf16.mxu0 %v3254_v13 }
 0x31e   :  { %2528 = vmatpush1.bf16.msra.mxu0 %v3257_v7  ;;  %v3270_v3 = vpack.c.bf16 %v784_v55, %v2735_v0 }
 0x31f   :  { %v3267_v12 = vpack.c.bf16 %v785_v46, %v2749_v2 }
 0x321   :  { %2433 = vmatmul.mubr.msk.f32.vlgmr.msra.gmra.mrb[4].mxu0 %vm795_vm9, %v2431_v23  ;;  %2530 = vmatprep.subr.bf16.mxu1 %v3267_v12 }
 0x322   :  { %2532 = vmatpush1.bf16.msra.mxu1 %v3270_v3  ;;  %1149 = vmatprep.mubr.f32.mxu0 %v4067_v4 }
 0x325   :  { %2434 = vmatmul.mubr.msk.f32.vlgmr.msra.gmra.mrb[4].mxu1 %vm795_vm9, %v2431_v23 }
 0x326   :  { %1220 = vmatprep.mubr.f32.mxu1 %v4067_v4 }
 0x3f4   :  { %v865_v5 = vpop.f32.mrb[4].mxu0 }
 0x3f5   :  { %v866_v6 = vadd.f32 %v865_v5, %v793_v1  ;;  %v867_v24 = vpop.f32.mrb[5].mxu0 }
 0x3f6   :  { %v868_v15 = vadd.f32 %v867_v24, %v793_v1 }
 0x3f7   :  { %v3276_v2 = vmax.f32 %v866_v6, 0.0 }
 0x3f8   :  { %v3278_v22 = vmax.f32 %v868_v15, 0.0  ;;  %v936_v0 = vpop.f32.mrb[4].mxu1 }
 0x3f9   :  { %v937_v28 = vadd.f32 %v936_v0, %v793_v1  ;;  %v938_v17 = vpop.f32.mrb[5].mxu1  ;;  %947 = vrot.lane.b32.xlu0 %v3276_v2, %s2697_s19 }
 0x3fa   :  { %v939_v29 = vadd.f32 %v938_v17, %v793_v1  ;;  %949 = vrot.lane.b32.xlu1 %v3278_v22, %s2697_s19 }
 0x3fb   :  { %v3284_v19 = vmax.f32 %v937_v28, 0.0 }
 0x3fc   :  { %v3286_v49 = vmax.f32 %v939_v29, 0.0 }
 0x3fd   :  { %951 = vrot.lane.b32.xlu0 %v3284_v19, %s2697_s19 }
 0x3fe   :  { %953 = vrot.lane.b32.xlu1 %v3286_v49, %s2697_s19 }
 0x401   :  { %963 = vrot.lane.b32.xlu0 %v3276_v2, %s2698_s24 }
 0x402   :  { %965 = vrot.lane.b32.xlu1 %v3278_v22, %s2698_s24 }
 0x405   :  { %967 = vrot.lane.b32.xlu0 %v3284_v19, %s2698_s24 }
 0x406   :  { %969 = vrot.lane.b32.xlu1 %v3286_v49, %s2698_s24 }
 0x409   :  { %979 = vrot.lane.b32.xlu0 %v3276_v2, %s2699_s0 }
 0x40a   :  { %981 = vrot.lane.b32.xlu1 %v3278_v22, %s2699_s0 }
 0x40d   :  { %983 = vrot.lane.b32.xlu0 %v3284_v19, %s2699_s0 }
 0x40e   :  { %985 = vrot.lane.b32.xlu1 %v3286_v49, %s2699_s0 }
 0x411   :  { %995 = vrot.lane.b32.xlu0 %v3276_v2, %s2700_s25 }
 0x412   :  { %997 = vrot.lane.b32.xlu1 %v3278_v22, %s2700_s25 }
 0x415   :  { %999 = vrot.lane.b32.xlu0 %v3284_v19, %s2700_s25 }
 0x416   :  { %1001 = vrot.lane.b32.xlu1 %v3286_v49, %s2700_s25 }
 0x419   :  { %1011 = vrot.lane.b32.xlu0 %v3276_v2, %s2701_s26 }
 0x41a   :  { %1013 = vrot.lane.b32.xlu1 %v3278_v22, %s2701_s26 }
 0x41d   :  { %1015 = vrot.lane.b32.xlu0 %v3284_v19, %s2701_s26 }
 0x41e   :  { %1017 = vrot.lane.b32.xlu1 %v3286_v49, %s2701_s26 }
 0x421   :  { %1027 = vrot.lane.b32.xlu0 %v3276_v2, %s2702_s27 }
 0x422   :  { %1029 = vrot.lane.b32.xlu1 %v3278_v22, %s2702_s27 }
 0x425   :  { %1031 = vrot.lane.b32.xlu0 %v3284_v19, %s2702_s27 }
 0x426   :  { %1033 = vrot.lane.b32.xlu1 %v3286_v49, %s2702_s27 }
 0x429   :  { %1043 = vrot.lane.b32.xlu0 %v3276_v2, %s2703_s28 }
 0x42a   :  { %1045 = vrot.lane.b32.xlu1 %v3278_v22, %s2703_s28 }
 0x42d   :  { %1047 = vrot.lane.b32.xlu0 %v3284_v19, %s2703_s28 }
 0x42e   :  { %1049 = vrot.lane.b32.xlu1 %v3286_v49, %s2703_s28 }
 0x431   :  { %1059 = vrot.lane.b32.xlu0 %v3276_v2, %s2706_s29 }
 0x432   :  { %1061 = vrot.lane.b32.xlu1 %v3278_v22, %s2706_s29 }
 0x435   :  { %1063 = vrot.lane.b32.xlu0 %v3284_v19, %s2706_s29 }
 0x436   :  { %1065 = vrot.lane.b32.xlu1 %v3286_v49, %s2706_s29 }
 0x439   :  { %1079 = vperm.xlu0 %2695, %v2436_v54  }
 0x46b   :  { %v948_v34 = vpop.permute.xlu0 %947 }
 0x46c   :  { %v950_v56 = vpop.permute.xlu1 %949 }
 0x46d   :  { %v957_v60 = vsel %vm216_vm0, %v948_v34, %v950_v56 }
 0x46e   :  { %v960_v18 = vmul.f32 %v957_v60, %v2840_v20 }
 0x46f   :  { %v952_v52 = vpop.permute.xlu0 %951 }
 0x470   :  { %v954_v57 = vpop.permute.xlu1 %953  ;;  %v956_v5 = vsel %vm216_vm0, %v950_v56, %v952_v52 }
 0x471   :  { %v955_v46 = vsel %vm216_vm0, %v952_v52, %v954_v57  ;;  %v958_v23 = vsel %vm216_vm0, %v954_v57, %v948_v34  ;;  %v961_v52 = vmul.f32 %v956_v5, %v2864_v31 }
 0x472   :  { %v959_v29 = vmul.f32 %v958_v23, %v2848_v25  ;;  %v962_v54 = vmul.f32 %v955_v46, %v2854_v27 }
 0x473   :  { %v964_v8 = vpop.permute.xlu0 %963 }
 0x474   :  { %v966_v53 = vpop.permute.xlu1 %965 }
 0x475   :  { %v973_v14 = vsel %vm233_vm1, %v964_v8, %v966_v53 }
 0x476   :  { %v976_v55 = vmul.f32 %v973_v14, %v2843_v21 }
 0x477   :  { %v968_v1 = vpop.permute.xlu0 %967 }
 0x478   :  { %v972_v6 = vsel %vm233_vm1, %v966_v53, %v968_v1  ;;  %v970_v24 = vpop.permute.xlu1 %969  ;;  %v2533_v15 = vpack.c.bf16 %v976_v55, %v960_v18 }
 0x479   :  { %v977_v0 = vmul.f32 %v972_v6, %v2871_v35  ;;  %v971_v28 = vsel %vm233_vm1, %v968_v1, %v970_v24  ;;  %v974_v17 = vsel %vm233_vm1, %v970_v24, %v964_v8 }
 0x47a   :  { %v975_v34 = vmul.f32 %v974_v17, %v2851_v26  ;;  %v978_v56 = vmul.f32 %v971_v28, %v2861_v30  ;;  %2534 = vmatprep.subr.bf16.mxu0 %v2533_v15 }
 0x47b   :  { %v980_v57 = vpop.permute.xlu0 %979  ;;  %v2551_v18 = vpack.c.bf16 %v977_v0, %v961_v52 }
 0x47c   :  { %v2535_v60 = vpack.c.bf16 %v975_v34, %v959_v29  ;;  %v982_v53 = vpop.permute.xlu1 %981  ;;  %v2549_v14 = vpack.c.bf16 %v978_v56, %v962_v54 }
 0x47d   :  { %v989_v46 = vsel %vm250_vm2, %v980_v57, %v982_v53 }
 0x47e   :  { %2536 = vmatpush1.bf16.msra.mxu0 %v2535_v60  ;;  %2550 = vmatprep.subr.bf16.mxu1 %v2549_v14  ;;  %v992_v5 = vmul.f32 %v989_v46, %v2896_v58 }
 0x47f   :  { %2552 = vmatpush1.bf16.msra.mxu1 %v2551_v18  ;;  %v984_v8 = vpop.permute.xlu0 %983 }
 0x480   :  { %v986_v55 = vpop.permute.xlu1 %985  ;;  %v988_v17 = vsel %vm250_vm2, %v982_v53, %v984_v8 }
 0x481   :  { %v987_v15 = vsel %vm250_vm2, %v984_v8, %v986_v55  ;;  %v990_v0 = vsel %vm250_vm2, %v986_v55, %v980_v57  ;;  %v993_v8 = vmul.f32 %v988_v17, %v2907_v62 }
 0x482   :  { %v991_v14 = vmul.f32 %v990_v0, %v2904_v61  ;;  %v994_v57 = vmul.f32 %v987_v15, %v2910_v63 }
 0x483   :  { %v996_v23 = vpop.permute.xlu0 %995 }
 0x484   :  { %v998_v1 = vpop.permute.xlu1 %997 }
 0x485   :  { %v1005_v6 = vsel %vm267_vm3, %v996_v23, %v998_v1 }
 0x486   :  { %v1008_v24 = vmul.f32 %v1005_v6, %v2899_v59 }
 0x487   :  { %v1000_v28 = vpop.permute.xlu0 %999 }
 0x488   :  { %v1004_v29 = vsel %vm267_vm3, %v998_v1, %v1000_v28  ;;  %v1002_v54 = vpop.permute.xlu1 %1001  ;;  %v2537_v34 = vpack.c.bf16 %v1008_v24, %v992_v5 }
 0x489   :  { %v1009_v56 = vmul.f32 %v1004_v29, %v2920_v10  ;;  %v1003_v52 = vsel %vm267_vm3, %v1000_v28, %v1002_v54  ;;  %v1006_v60 = vsel %vm267_vm3, %v1002_v54, %v996_v23 }
 0x48a   :  { %v1007_v18 = vmul.f32 %v1006_v60, %v2917_v9  ;;  %v1010_v53 = vmul.f32 %v1003_v52, %v2927_v16  ;;  %2538 = vmatprep.subr.bf16.mxu0 %v2537_v34 }
 0x48b   :  { %v1012_v55 = vpop.permute.xlu0 %1011  ;;  %v2555_v5 = vpack.c.bf16 %v1009_v56, %v993_v8 }
 0x48c   :  { %v2539_v46 = vpack.c.bf16 %v1007_v18, %v991_v14  ;;  %v1014_v1 = vpop.permute.xlu1 %1013  ;;  %v2553_v6 = vpack.c.bf16 %v1010_v53, %v994_v57 }
 0x48d   :  { %v1021_v24 = vsel %vm284_vm4, %v1012_v55, %v1014_v1 }
 0x48e   :  { %2540 = vmatpush1.bf16.msra.mxu0 %v2539_v46  ;;  %2554 = vmatprep.subr.bf16.mxu1 %v2553_v6  ;;  %v1023_v15 = vmul.f32 %v1021_v24, %v2948_v47 }
 0x48f   :  { %2556 = vmatpush1.bf16.msra.mxu1 %v2555_v5  ;;  %v1016_v23 = vpop.permute.xlu0 %1015 }
 0x490   :  { %v1020_v0 = vsel %vm284_vm4, %v1014_v1, %v1016_v23  ;;  %v1018_v28 = vpop.permute.xlu1 %1017  ;;  %v2543_v14 = vpack.c.bf16 %v1023_v15, %v3276_v2 }
 0x491   :  { %v1024_v17 = vmul.f32 %v1020_v0, %v2956_v50  ;;  %v1019_v29 = vsel %vm284_vm4, %v1016_v23, %v1018_v28  ;;  %v1022_v54 = vsel %vm284_vm4, %v1018_v28, %v1012_v55 }
 0x492   :  { %v1025_v34 = vmul.f32 %v1019_v29, %v2959_v51  ;;  %v1026_v56 = vmul.f32 %v1022_v54, %v2951_v48 }
 0x493   :  { %v1028_v52 = vpop.permute.xlu0 %1027  ;;  %v2541_v60 = vpack.c.bf16 %v1024_v17, %v3278_v22 }
 0x494   :  { %v2559_v57 = vpack.c.bf16 %v1025_v34, %v3284_v19  ;;  %v1030_v18 = vpop.permute.xlu1 %1029  ;;  %v2557_v53 = vpack.c.bf16 %v1026_v56, %v3286_v49 }
 0x495   :  { %2542 = vmatprep.subr.bf16.mxu0 %v2541_v60  ;;  %v1037_v6 = vsel %vm301_vm6, %v1028_v52, %v1030_v18 }
 0x496   :  { %2544 = vmatpush1.bf16.msra.mxu0 %v2543_v14  ;;  %2558 = vmatprep.subr.bf16.mxu1 %v2557_v53  ;;  %v1039_v28 = vmul.f32 %v1037_v6, %v3011_v45 }
 0x497   :  { %2560 = vmatpush1.bf16.msra.mxu1 %v2559_v57  ;;  %v1032_v8 = vpop.permute.xlu0 %1031 }
 0x498   :  { %v1034_v55 = vpop.permute.xlu1 %1033  ;;  %v1036_v24 = vsel %vm301_vm6, %v1030_v18, %v1032_v8 }
 0x499   :  { %v1035_v23 = vsel %vm301_vm6, %v1032_v8, %v1034_v55  ;;  %v1038_v15 = vsel %vm301_vm6, %v1034_v55, %v1028_v52  ;;  %v1040_v34 = vmul.f32 %v1036_v24, %v2987_v33 }
 0x49a   :  { %v1041_v52 = vmul.f32 %v1035_v23, %v2992_v38  ;;  %v1042_v57 = vmul.f32 %v1038_v15, %v2984_v32 }
 0x49b   :  { %v1044_v46 = vpop.permute.xlu0 %1043 }
 0x49c   :  { %v1046_v1 = vpop.permute.xlu1 %1045 }
 0x49d   :  { %v1053_v5 = vsel %vm318_vm5, %v1044_v46, %v1046_v1 }
 0x49e   :  { %v1055_v17 = vmul.f32 %v1053_v5, %v2997_v40 }
 0x49f   :  { %v1048_v0 = vpop.permute.xlu0 %1047 }
 0x4a0   :  { %v1052_v29 = vsel %vm318_vm5, %v1046_v1, %v1048_v0  ;;  %v1050_v54 = vpop.permute.xlu1 %1049  ;;  %v2547_v1 = vpack.c.bf16 %v1055_v17, %v1039_v28 }
 0x4a1   :  { %v1056_v56 = vmul.f32 %v1052_v29, %v3005_v43  ;;  %v1051_v60 = vsel %vm318_vm5, %v1048_v0, %v1050_v54  ;;  %v1054_v14 = vsel %vm318_vm5, %v1050_v54, %v1044_v46 }
 0x4a2   :  { %v1057_v18 = vmul.f32 %v1051_v60, %v3008_v44  ;;  %v1058_v53 = vmul.f32 %v1054_v14, %v3002_v42  ;;  %v2435_v60 = vld [vmem:[%s4065_s2 + $0x10] sm:$0xff] }
 0x4a3   :  { %v1060_v8 = vpop.permute.xlu0 %1059  ;;  %v2545_v55 = vpack.c.bf16 %v1056_v56, %v1040_v34 }
 0x4a4   :  { %v2563_v6 = vpack.c.bf16 %v1057_v18, %v1041_v52  ;;  %v1062_v5 = vpop.permute.xlu1 %1061  ;;  %v2561_v24 = vpack.c.bf16 %v1058_v53, %v1042_v57 }
 0x4a5   :  { %2546 = vmatprep.subr.bf16.mxu0 %v2545_v55  ;;  %v1069_v46 = vsel %vm335_vm7, %v1060_v8, %v1062_v5 }
 0x4a6   :  { %2548 = vmatpush1.bf16.msra.mxu0 %v2547_v1  ;;  %2562 = vmatprep.subr.bf16.mxu1 %v2561_v24  ;;  %v1071_v54 = vmul.f32 %v1069_v46, %v3045_v41 }
 0x4a7   :  { %2564 = vmatpush1.bf16.msra.mxu1 %v2563_v6  ;;  %v1064_v23 = vpop.permute.xlu0 %1063 }
 0x4a8   :  { %v1068_v15 = vsel %vm335_vm7, %v1062_v5, %v1064_v23  ;;  %v1066_v0 = vpop.permute.xlu1 %1065 }
 0x4a9   :  { %v1067_v29 = vsel %vm335_vm7, %v1064_v23, %v1066_v0  ;;  %v1070_v28 = vsel %vm335_vm7, %v1066_v0, %v1060_v8  ;;  %v1072_v17 = vmul.f32 %v1068_v15, %v3036_v36  ;;  %v2440_v15 = vld [vmem:[%s4063_s3 + $0x18] sm:$0xff] }
 0x4aa   :  { %v1073_v34 = vmul.f32 %v1067_v29, %v3042_v39  ;;  %v1074_v56 = vmul.f32 %v1070_v28, %v3039_v37  ;;  %v2444_v0 = vld [vmem:[%s4063_s3 + $0x38] sm:$0xff] }
 0x4ab   :  { %1101 = vmatprep.subr.mxu0 %v1072_v17 }
 0x4ac   :  { %1102 = vmatpush1.msra.mxu0 %v1071_v54  ;;  %1172 = vmatprep.subr.mxu1 %v1074_v56 }
 0x4ad   :  { %2437 = vmatmul.mubr.msk.f32.vlgmr.msra.gmra.mrb[6].mxu0 %vm350_vm8, %v2435_v60  ;;  %1173 = vmatpush1.msra.mxu1 %v1073_v34 }
 0x4ae   :  { %2438 = vmatmul.mubr.msk.f32.vlgmr.msra.gmra.mrb[6].mxu1 %vm350_vm8, %v2435_v60  ;;  %1435 = vmatprep.mubr.f32.mxu0 %v4067_v4 }
 0x4af   :  { %1506 = vmatprep.mubr.f32.mxu1 %v4067_v4 }
 0x4b8   :  { %v1080_v14 = vpop.permute.xlu0 %1079 }
 0x580   :  { %v1151_v52 = vpop.f32.mrb[6].mxu0 }
 0x581   :  { %v1152_v57 = vadd.f32 %v1151_v52, %v1080_v14  ;;  %v1153_v18 = vpop.f32.mrb[7].mxu0  ;;  %v1222_v53 = vpop.f32.mrb[6].mxu1 }
 0x582   :  { %v1154_v8 = vadd.f32 %v1153_v18, %v1080_v14  ;;  %v1224_v55 = vpop.f32.mrb[7].mxu1  ;;  %v1223_v6 = vadd.f32 %v1222_v53, %v1080_v14 }
 0x583   :  { %v3458_v1 = vmax.f32 %v1152_v57, 0.0  ;;  %v1225_v24 = vadd.f32 %v1224_v55, %v1080_v14 }
 0x584   :  { %v3460_v5 = vmax.f32 %v1154_v8, 0.0  ;;  %v3466_v46 = vmax.f32 %v1223_v6, 0.0 }
 0x585   :  { %1233 = vrot.lane.b32.xlu1 %v3458_v1, %s2697_s19  ;;  %v3468_v23 = vmax.f32 %v1225_v24, 0.0 }
 0x586   :  { %1235 = vrot.lane.b32.xlu0 %v3460_v5, %s2697_s19 }
 0x589   :  { %1237 = vrot.lane.b32.xlu1 %v3466_v46, %s2697_s19 }
 0x58a   :  { %1239 = vrot.lane.b32.xlu0 %v3468_v23, %s2697_s19 }
 0x58d   :  { %1249 = vrot.lane.b32.xlu1 %v3458_v1, %s2698_s24 }
 0x58e   :  { %1251 = vrot.lane.b32.xlu0 %v3460_v5, %s2698_s24 }
 0x591   :  { %1253 = vrot.lane.b32.xlu1 %v3466_v46, %s2698_s24 }
 0x592   :  { %1255 = vrot.lane.b32.xlu0 %v3468_v23, %s2698_s24 }
 0x595   :  { %1265 = vrot.lane.b32.xlu1 %v3458_v1, %s2699_s0 }
 0x596   :  { %1267 = vrot.lane.b32.xlu0 %v3460_v5, %s2699_s0 }
 0x599   :  { %1269 = vrot.lane.b32.xlu1 %v3466_v46, %s2699_s0 }
 0x59a   :  { %1271 = vrot.lane.b32.xlu0 %v3468_v23, %s2699_s0 }
 0x59d   :  { %1281 = vrot.lane.b32.xlu1 %v3458_v1, %s2700_s25 }
 0x59e   :  { %1283 = vrot.lane.b32.xlu0 %v3460_v5, %s2700_s25 }
 0x5a1   :  { %1285 = vrot.lane.b32.xlu1 %v3466_v46, %s2700_s25 }
 0x5a2   :  { %1287 = vrot.lane.b32.xlu0 %v3468_v23, %s2700_s25 }
 0x5a5   :  { %1297 = vrot.lane.b32.xlu1 %v3458_v1, %s2701_s26 }
 0x5a6   :  { %1299 = vrot.lane.b32.xlu0 %v3460_v5, %s2701_s26 }
 0x5a9   :  { %1301 = vrot.lane.b32.xlu1 %v3466_v46, %s2701_s26 }
 0x5aa   :  { %1303 = vrot.lane.b32.xlu0 %v3468_v23, %s2701_s26 }
 0x5ad   :  { %1313 = vrot.lane.b32.xlu1 %v3458_v1, %s2702_s27 }
 0x5ae   :  { %1315 = vrot.lane.b32.xlu0 %v3460_v5, %s2702_s27 }
 0x5b1   :  { %1317 = vrot.lane.b32.xlu1 %v3466_v46, %s2702_s27 }
 0x5b2   :  { %1319 = vrot.lane.b32.xlu0 %v3468_v23, %s2702_s27 }
 0x5b5   :  { %1329 = vrot.lane.b32.xlu1 %v3458_v1, %s2703_s28 }
 0x5b6   :  { %1331 = vrot.lane.b32.xlu0 %v3460_v5, %s2703_s28 }
 0x5b9   :  { %1333 = vrot.lane.b32.xlu1 %v3466_v46, %s2703_s28 }
 0x5ba   :  { %1335 = vrot.lane.b32.xlu0 %v3468_v23, %s2703_s28 }
 0x5bd   :  { %1345 = vrot.lane.b32.xlu1 %v3458_v1, %s2706_s29 }
 0x5be   :  { %1347 = vrot.lane.b32.xlu0 %v3460_v5, %s2706_s29 }
 0x5c1   :  { %1349 = vrot.lane.b32.xlu1 %v3466_v46, %s2706_s29 }
 0x5c2   :  { %1351 = vrot.lane.b32.xlu0 %v3468_v23, %s2706_s29 }
 0x5c5   :  { %1365 = vperm.xlu1 %2696, %v2440_v15  }
 0x5c6   :  { %1523 = vperm.xlu0 %2695, %v2444_v0  }
 0x5f7   :  { %v1234_v29 = vpop.permute.xlu1 %1233 }
 0x5f8   :  { %v1236_v28 = vpop.permute.xlu0 %1235 }
 0x5f9   :  { %v1243_v34 = vsel %vm216_vm0, %v1234_v29, %v1236_v28 }
 0x5fa   :  { %v1246_v52 = vmul.f32 %v1243_v34, %v2840_v20 }
 0x5fb   :  { %v1238_v17 = vpop.permute.xlu1 %1237 }
 0x5fc   :  { %v1240_v54 = vpop.permute.xlu0 %1239  ;;  %v1242_v55 = vsel %vm216_vm0, %v1236_v28, %v1238_v17 }
 0x5fd   :  { %v1241_v18 = vsel %vm216_vm0, %v1238_v17, %v1240_v54  ;;  %v1244_v53 = vsel %vm216_vm0, %v1240_v54, %v1234_v29  ;;  %v1247_v17 = vmul.f32 %v1242_v55, %v2864_v31 }
 0x5fe   :  { %v1245_v4 = vmul.f32 %v1244_v53, %v2848_v25  ;;  %v1248_v29 = vmul.f32 %v1241_v18, %v2854_v27 }
 0x5ff   :  { %v1250_v56 = vpop.permute.xlu1 %1249 }
 0x600   :  { %v1252_v60 = vpop.permute.xlu0 %1251 }
 0x601   :  { %v1259_v14 = vsel %vm233_vm1, %v1250_v56, %v1252_v60 }
 0x602   :  { %v1262_v57 = vmul.f32 %v1259_v14, %v2843_v21 }
 0x603   :  { %v1254_v8 = vpop.permute.xlu1 %1253 }
 0x604   :  { %v1258_v6 = vsel %vm233_vm1, %v1252_v60, %v1254_v8  ;;  %v1256_v24 = vpop.permute.xlu0 %1255  ;;  %v2565_v15 = vpack.c.bf16 %v1262_v57, %v1246_v52 }
 0x605   :  { %v1263_v0 = vmul.f32 %v1258_v6, %v2871_v35  ;;  %v1257_v34 = vsel %vm233_vm1, %v1254_v8, %v1256_v24  ;;  %v1260_v14 = vsel %vm233_vm1, %v1256_v24, %v1250_v56 }
 0x606   :  { %v1261_v54 = vmul.f32 %v1260_v14, %v2851_v26  ;;  %v1264_v28 = vmul.f32 %v1257_v34, %v2861_v30  ;;  %2566 = vmatprep.subr.bf16.mxu0 %v2565_v15 }
 0x607   :  { %v1266_v60 = vpop.permute.xlu1 %1265  ;;  %v2583_v35 = vpack.c.bf16 %v1263_v0, %v1247_v17 }
 0x608   :  { %v2567_v52 = vpack.c.bf16 %v1261_v54, %v1245_v4  ;;  %v1268_v57 = vpop.permute.xlu0 %1267  ;;  %v2581_v6 = vpack.c.bf16 %v1264_v28, %v1248_v29 }
 0x609   :  { %v1275_v18 = vsel %vm250_vm2, %v1266_v60, %v1268_v57 }
 0x60a   :  { %2568 = vmatpush1.bf16.msra.mxu0 %v2567_v52  ;;  %2582 = vmatprep.subr.bf16.mxu1 %v2581_v6  ;;  %v1278_v55 = vmul.f32 %v1275_v18, %v2896_v58 }
 0x60b   :  { %2584 = vmatpush1.bf16.msra.mxu1 %v2583_v35  ;;  %v1270_v56 = vpop.permute.xlu1 %1269 }
 0x60c   :  { %v1272_v8 = vpop.permute.xlu0 %1271  ;;  %v1274_v14 = vsel %vm250_vm2, %v1268_v57, %v1270_v56 }
 0x60d   :  { %v1273_v0 = vsel %vm250_vm2, %v1270_v56, %v1272_v8  ;;  %v1276_v35 = vsel %vm250_vm2, %v1272_v8, %v1266_v60  ;;  %v1279_v56 = vmul.f32 %v1274_v14, %v2907_v62 }
 0x60e   :  { %v1277_v18 = vmul.f32 %v1276_v35, %v2904_v61  ;;  %v1280_v60 = vmul.f32 %v1273_v0, %v2910_v63 }
 0x60f   :  { %v1282_v53 = vpop.permute.xlu1 %1281 }
 0x610   :  { %v1284_v24 = vpop.permute.xlu0 %1283 }
 0x611   :  { %v1291_v15 = vsel %vm267_vm3, %v1282_v53, %v1284_v24 }
 0x612   :  { %v1294_v4 = vmul.f32 %v1291_v15, %v2899_v59 }
 0x613   :  { %v1286_v34 = vpop.permute.xlu1 %1285 }
 0x614   :  { %v1290_v29 = vsel %vm267_vm3, %v1284_v24, %v1286_v34  ;;  %v1288_v54 = vpop.permute.xlu0 %1287  ;;  %v2569_v28 = vpack.c.bf16 %v1294_v4, %v1278_v55 }
 0x615   :  { %v1295_v17 = vmul.f32 %v1290_v29, %v2920_v10  ;;  %v1289_v52 = vsel %vm267_vm3, %v1286_v34, %v1288_v54  ;;  %v1292_v6 = vsel %vm267_vm3, %v1288_v54, %v1282_v53 }
 0x616   :  { %v1293_v8 = vmul.f32 %v1292_v6, %v2917_v9  ;;  %v1296_v57 = vmul.f32 %v1289_v52, %v2927_v16  ;;  %2570 = vmatprep.subr.bf16.mxu0 %v2569_v28 }
 0x617   :  { %v1298_v24 = vpop.permute.xlu1 %1297  ;;  %v2587_v29 = vpack.c.bf16 %v1295_v17, %v1279_v56 }
 0x618   :  { %v2571_v15 = vpack.c.bf16 %v1293_v8, %v1277_v18  ;;  %v1300_v55 = vpop.permute.xlu0 %1299  ;;  %v2585_v4 = vpack.c.bf16 %v1296_v57, %v1280_v60 }
 0x619   :  { %v1307_v34 = vsel %vm284_vm4, %v1298_v24, %v1300_v55 }
 0x61a   :  { %2572 = vmatpush1.bf16.msra.mxu0 %v2571_v15  ;;  %2586 = vmatprep.subr.bf16.mxu1 %v2585_v4  ;;  %v1309_v0 = vmul.f32 %v1307_v34, %v2948_v47 }
 0x61b   :  { %2588 = vmatpush1.bf16.msra.mxu1 %v2587_v29  ;;  %v1302_v53 = vpop.permute.xlu1 %1301 }
 0x61c   :  { %v1306_v35 = vsel %vm284_vm4, %v1300_v55, %v1302_v53  ;;  %v1304_v54 = vpop.permute.xlu0 %1303  ;;  %v2575_v8 = vpack.c.bf16 %v1309_v0, %v3458_v1 }
 0x61d   :  { %v1310_v14 = vmul.f32 %v1306_v35, %v2956_v50  ;;  %v1305_v28 = vsel %vm284_vm4, %v1302_v53, %v1304_v54  ;;  %v1308_v17 = vsel %vm284_vm4, %v1304_v54, %v1298_v24 }
 0x61e   :  { %v1311_v52 = vmul.f32 %v1305_v28, %v2959_v51  ;;  %v1312_v6 = vmul.f32 %v1308_v17, %v2951_v48 }
 0x61f   :  { %v1314_v18 = vpop.permute.xlu1 %1313  ;;  %v2573_v60 = vpack.c.bf16 %v1310_v14, %v3460_v5 }
 0x620   :  { %v2591_v57 = vpack.c.bf16 %v1311_v52, %v3466_v46  ;;  %v1316_v56 = vpop.permute.xlu0 %1315  ;;  %v2589_v15 = vpack.c.bf16 %v1312_v6, %v3468_v23 }
 0x621   :  { %2574 = vmatprep.subr.bf16.mxu0 %v2573_v60  ;;  %v1323_v34 = vsel %vm301_vm6, %v1314_v18, %v1316_v56 }
 0x622   :  { %2576 = vmatpush1.bf16.msra.mxu0 %v2575_v8  ;;  %2590 = vmatprep.subr.bf16.mxu1 %v2589_v15  ;;  %v1325_v0 = vmul.f32 %v1323_v34, %v3011_v45 }
 0x623   :  { %2592 = vmatpush1.bf16.msra.mxu1 %v2591_v57  ;;  %v1318_v55 = vpop.permute.xlu1 %1317 }
 0x624   :  { %v1320_v24 = vpop.permute.xlu0 %1319  ;;  %v1322_v1 = vsel %vm301_vm6, %v1316_v56, %v1318_v55 }
 0x625   :  { %v1321_v46 = vsel %vm301_vm6, %v1318_v55, %v1320_v24  ;;  %v1324_v23 = vsel %vm301_vm6, %v1320_v24, %v1314_v18  ;;  %v1326_v28 = vmul.f32 %v1322_v1, %v2987_v33 }
 0x626   :  { %v1327_v18 = vmul.f32 %v1321_v46, %v2992_v38  ;;  %v1328_v60 = vmul.f32 %v1324_v23, %v2984_v32 }
 0x627   :  { %v1330_v4 = vpop.permute.xlu1 %1329 }
 0x628   :  { %v1332_v29 = vpop.permute.xlu0 %1331 }
 0x629   :  { %v1339_v5 = vsel %vm318_vm5, %v1330_v4, %v1332_v29 }
 0x62a   :  { %v1341_v35 = vmul.f32 %v1339_v5, %v2997_v40 }
 0x62b   :  { %v1334_v53 = vpop.permute.xlu1 %1333 }
 0x62c   :  { %v1338_v54 = vsel %vm318_vm5, %v1332_v29, %v1334_v53  ;;  %v1336_v14 = vpop.permute.xlu0 %1335  ;;  %v2579_v55 = vpack.c.bf16 %v1341_v35, %v1325_v0 }
 0x62d   :  { %v1342_v17 = vmul.f32 %v1338_v54, %v3005_v43  ;;  %v1337_v52 = vsel %vm318_vm5, %v1334_v53, %v1336_v14  ;;  %v1340_v6 = vsel %vm318_vm5, %v1336_v14, %v1330_v4 }
 0x62e   :  { %v1343_v8 = vmul.f32 %v1337_v52, %v3008_v44  ;;  %v1344_v57 = vmul.f32 %v1340_v6, %v3002_v42 }
 0x62f   :  { %v1346_v56 = vpop.permute.xlu1 %1345  ;;  %v2577_v15 = vpack.c.bf16 %v1342_v17, %v1326_v28  ;;  %v2439_v28 = vld [vmem:[%s4065_s2 + $0x18] sm:$0xff]  ;;  %v4076_v17 = vmov 0.0  }
 0x630   :  { %v2595_v24 = vpack.c.bf16 %v1343_v8, %v1327_v18  ;;  %v1348_v29 = vpop.permute.xlu0 %1347  ;;  %v2593_v34 = vpack.c.bf16 %v1344_v57, %v1328_v60 }
 0x631   :  { %2578 = vmatprep.subr.bf16.mxu0 %v2577_v15  ;;  %v1355_v4 = vsel %vm335_vm7, %v1346_v56, %v1348_v29 }
 0x632   :  { %2580 = vmatpush1.bf16.msra.mxu0 %v2579_v55  ;;  %2594 = vmatprep.subr.bf16.mxu1 %v2593_v34  ;;  %v1357_v35 = vmul.f32 %v1355_v4, %v3045_v41  ;;  %v2443_v4 = vld [vmem:[%s4065_s2 + $0x38] sm:$0xff] }
 0x633   :  { %2596 = vmatpush1.bf16.msra.mxu1 %v2595_v24  ;;  %v1350_v5 = vpop.permute.xlu1 %1349 }
 0x634   :  { %v1354_v1 = vsel %vm335_vm7, %v1348_v29, %v1350_v5  ;;  %v1352_v46 = vpop.permute.xlu0 %1351 }
 0x635   :  { %v1358_v23 = vmul.f32 %v1354_v1, %v3036_v36  ;;  %v1353_v53 = vsel %vm335_vm7, %v1350_v5, %v1352_v46  ;;  %v1356_v0 = vsel %vm335_vm7, %v1352_v46, %v1346_v56 }
 0x636   :  { %v1359_v54 = vmul.f32 %v1353_v53, %v3042_v39  ;;  %v1360_v14 = vmul.f32 %v1356_v0, %v3039_v37 }
 0x637   :  { %1387 = vmatprep.subr.mxu0 %v1358_v23 }
 0x638   :  { %1388 = vmatpush1.msra.mxu0 %v1357_v35  ;;  %1458 = vmatprep.subr.mxu1 %v1360_v14 }
 0x639   :  { %2441 = vmatmul.mubr.msk.f32.vlgmr.msra.gmra.mrb[8].mxu0 %vm350_vm8, %v2439_v28  ;;  %1459 = vmatpush1.msra.mxu1 %v1359_v54 }
 0x63a   :  { %2598 = vmatprep.subr.bf16.mxu0 %v3254_v13  ;;  %2442 = vmatmul.mubr.msk.f32.vlgmr.msra.gmra.mrb[8].mxu1 %vm350_vm8, %v2439_v28 }
 0x63b   :  { %2600 = vmatpush1.bf16.msra.mxu0 %v3257_v7  ;;  %2602 = vmatprep.subr.bf16.mxu1 %v3267_v12 }
 0x63c   :  { %2604 = vmatpush1.bf16.msra.mxu1 %v3270_v3  ;;  %1594 = vmatprep.mubr.f32.mxu0 %v4076_v17 }
 0x63d   :  { %1665 = vmatprep.mubr.f32.mxu1 %v4076_v17 }
 0x644   :  { %v1366_v52 = vpop.permute.xlu1 %1365 }
 0x70c   :  { %v1437_v6 = vpop.f32.mrb[8].mxu0 }
 0x70d   :  { %v1438_v18 = vadd.f32 %v1437_v6, %v1366_v52  ;;  %v1439_v60 = vpop.f32.mrb[9].mxu0  ;;  %v1508_v8 = vpop.f32.mrb[8].mxu1 }
 0x70e   :  { %v1440_v57 = vadd.f32 %v1439_v60, %v1366_v52  ;;  %v1509_v56 = vadd.f32 %v1508_v8, %v1366_v52  ;;  %v1510_v15 = vpop.f32.mrb[9].mxu1 }
 0x70f   :  { %v1511_v55 = vadd.f32 %v1510_v15, %v1366_v52  ;;  %v3651_v29 = vadd.f32 %v1438_v18, %v3276_v2  ;;  %v1524_v2 = vpop.permute.xlu0 %1523  ;;  %v2448_v52 = vld [vmem:[%s4063_s3 + $0x20] sm:$0xff] }
 0x710   :  { %v3648_v24 = vadd.f32 %v1440_v57, %v3278_v22  ;;  %v3660_v5 = vadd.f32 %v1509_v56, %v3284_v19 }
 0x711   :  { %4078 = vst [vmem:[#allocation4_spill] sm:$0xff] %v3651_v29  ;;  %v3654_v34 = vadd.f32 %v1511_v55, %v3286_v49 }
 0x712   :  { %4077 = vst [vmem:[#allocation3_spill] sm:$0xff] %v3648_v24  ;;  %4080 = vst [vmem:[#allocation6_spill] sm:$0xff] %v3660_v5  ;;  %1534 = vmatprep.subr.mxu0 %v3648_v24 }
 0x713   :  { %4079 = vst [vmem:[#allocation5_spill] sm:$0xff] %v3654_v34  ;;  %1535 = vmatpush1.msra.mxu0 %v3651_v29  ;;  %1605 = vmatprep.subr.mxu1 %v3654_v34 }
 0x714   :  { %2445 = vmatmul.mubr.msk.f32.vlgmr.msra.gmra.mrb[10].mxu0 %vm1526_vm10, %v2443_v4  ;;  %1606 = vmatpush1.msra.mxu1 %v3660_v5 }
 0x715   :  { %2446 = vmatmul.mubr.msk.f32.vlgmr.msra.gmra.mrb[10].mxu1 %vm1526_vm10, %v2443_v4  ;;  %1880 = vmatprep.mubr.f32.mxu0 %v4076_v17 }
 0x716   :  { %1951 = vmatprep.mubr.f32.mxu1 %v4076_v17 }
 0x7e7   :  { %v1596_v22 = vpop.f32.mrb[10].mxu0 }
 0x7e8   :  { %v1597_v49 = vadd.f32 %v1596_v22, %v1524_v2  ;;  %v1598_v1 = vpop.f32.mrb[11].mxu0  ;;  %v1667_v19 = vpop.f32.mrb[10].mxu1 }
 0x7e9   :  { %v1599_v46 = vadd.f32 %v1598_v1, %v1524_v2  ;;  %v1669_v23 = vpop.f32.mrb[11].mxu1  ;;  %v1668_v0 = vadd.f32 %v1667_v19, %v1524_v2 }
 0x7ea   :  { %v3668_v53 = vmax.f32 %v1597_v49, 0.0  ;;  %v1670_v54 = vadd.f32 %v1669_v23, %v1524_v2 }
 0x7eb   :  { %v3670_v35 = vmax.f32 %v1599_v46, 0.0  ;;  %v3676_v14 = vmax.f32 %v1668_v0, 0.0 }
 0x7ec   :  { %1678 = vrot.lane.b32.xlu1 %v3668_v53, %s2697_s19  ;;  %v3678_v28 = vmax.f32 %v1670_v54, 0.0  ;;  %v4081_v54 = vld [vmem:[#allocation2_spill] sm:$0xff] }
 0x7ed   :  { %1680 = vrot.lane.b32.xlu0 %v3670_v35, %s2697_s19 }
 0x7f0   :  { %1682 = vrot.lane.b32.xlu1 %v3676_v14, %s2697_s19 }
 0x7f1   :  { %1684 = vrot.lane.b32.xlu0 %v3678_v28, %s2697_s19 }
 0x7f4   :  { %1694 = vrot.lane.b32.xlu1 %v3668_v53, %s2698_s24 }
 0x7f5   :  { %1696 = vrot.lane.b32.xlu0 %v3670_v35, %s2698_s24 }
 0x7f8   :  { %1698 = vrot.lane.b32.xlu1 %v3676_v14, %s2698_s24 }
 0x7f9   :  { %1700 = vrot.lane.b32.xlu0 %v3678_v28, %s2698_s24 }
 0x7fc   :  { %1710 = vrot.lane.b32.xlu1 %v3668_v53, %s2699_s0 }
 0x7fd   :  { %1712 = vrot.lane.b32.xlu0 %v3670_v35, %s2699_s0 }
 0x800   :  { %1714 = vrot.lane.b32.xlu1 %v3676_v14, %s2699_s0 }
 0x801   :  { %1716 = vrot.lane.b32.xlu0 %v3678_v28, %s2699_s0 }
 0x804   :  { %1726 = vrot.lane.b32.xlu1 %v3668_v53, %s2700_s25 }
 0x805   :  { %1728 = vrot.lane.b32.xlu0 %v3670_v35, %s2700_s25 }
 0x808   :  { %1730 = vrot.lane.b32.xlu1 %v3676_v14, %s2700_s25 }
 0x809   :  { %1732 = vrot.lane.b32.xlu0 %v3678_v28, %s2700_s25 }
 0x80c   :  { %1742 = vrot.lane.b32.xlu1 %v3668_v53, %s2701_s26 }
 0x80d   :  { %1744 = vrot.lane.b32.xlu0 %v3670_v35, %s2701_s26 }
 0x810   :  { %1746 = vrot.lane.b32.xlu1 %v3676_v14, %s2701_s26 }
 0x811   :  { %1748 = vrot.lane.b32.xlu0 %v3678_v28, %s2701_s26 }
 0x814   :  { %1758 = vrot.lane.b32.xlu1 %v3668_v53, %s2702_s27 }
 0x815   :  { %1760 = vrot.lane.b32.xlu0 %v3670_v35, %s2702_s27 }
 0x818   :  { %1762 = vrot.lane.b32.xlu1 %v3676_v14, %s2702_s27 }
 0x819   :  { %1764 = vrot.lane.b32.xlu0 %v3678_v28, %s2702_s27 }
 0x81c   :  { %1774 = vrot.lane.b32.xlu1 %v3668_v53, %s2703_s28 }
 0x81d   :  { %1776 = vrot.lane.b32.xlu0 %v3670_v35, %s2703_s28 }
 0x820   :  { %1778 = vrot.lane.b32.xlu1 %v3676_v14, %s2703_s28 }
 0x821   :  { %1780 = vrot.lane.b32.xlu0 %v3678_v28, %s2703_s28 }
 0x824   :  { %1790 = vrot.lane.b32.xlu1 %v3668_v53, %s2706_s29 }
 0x825   :  { %1792 = vrot.lane.b32.xlu0 %v3670_v35, %s2706_s29 }
 0x828   :  { %1794 = vrot.lane.b32.xlu1 %v3676_v14, %s2706_s29 }
 0x829   :  { %1796 = vrot.lane.b32.xlu0 %v3678_v28, %s2706_s29 }
 0x82c   :  { %1810 = vperm.xlu1 %2696, %v2448_v52  }
 0x85e   :  { %v1679_v6 = vpop.permute.xlu1 %1678 }
 0x85f   :  { %v1681_v18 = vpop.permute.xlu0 %1680 }
 0x860   :  { %v1688_v57 = vsel %vm216_vm0, %v1679_v6, %v1681_v18 }
 0x861   :  { %v1691_v4 = vmul.f32 %v1688_v57, %v2840_v20 }
 0x862   :  { %v1683_v60 = vpop.permute.xlu1 %1682 }
 0x863   :  { %v1685_v8 = vpop.permute.xlu0 %1684  ;;  %v1687_v19 = vsel %vm216_vm0, %v1681_v18, %v1683_v60 }
 0x864   :  { %v1686_v22 = vsel %vm216_vm0, %v1683_v60, %v1685_v8  ;;  %v1689_v49 = vsel %vm216_vm0, %v1685_v8, %v1679_v6  ;;  %v1692_v60 = vmul.f32 %v1687_v19, %v2864_v31 }
 0x865   :  { %v1690_v5 = vmul.f32 %v1689_v49, %v2848_v25  ;;  %v1693_v6 = vmul.f32 %v1686_v22, %v2854_v27 }
 0x866   :  { %v1695_v56 = vpop.permute.xlu1 %1694 }
 0x867   :  { %v1697_v15 = vpop.permute.xlu0 %1696 }
 0x868   :  { %v1704_v55 = vsel %vm233_vm1, %v1695_v56, %v1697_v15 }
 0x869   :  { %v1707_v2 = vmul.f32 %v1704_v55, %v2843_v21 }
 0x86a   :  { %v1699_v1 = vpop.permute.xlu1 %1698 }
 0x86b   :  { %v1703_v46 = vsel %vm233_vm1, %v1697_v15, %v1699_v1  ;;  %v1701_v23 = vpop.permute.xlu0 %1700  ;;  %v2605_v0 = vpack.c.bf16 %v1707_v2, %v1691_v4 }
 0x86c   :  { %v1708_v52 = vmul.f32 %v1703_v46, %v4081_v54  ;;  %v1702_v57 = vsel %vm233_vm1, %v1699_v1, %v1701_v23  ;;  %v1705_v55 = vsel %vm233_vm1, %v1701_v23, %v1695_v56 }
 0x86d   :  { %v1706_v8 = vmul.f32 %v1705_v55, %v2851_v26  ;;  %v1709_v18 = vmul.f32 %v1702_v57, %v2861_v30  ;;  %2606 = vmatprep.subr.bf16.mxu0 %v2605_v0 }
 0x86e   :  { %v1711_v15 = vpop.permute.xlu1 %1710  ;;  %v2623_v34 = vpack.c.bf16 %v1708_v52, %v1692_v60 }
 0x86f   :  { %v2607_v4 = vpack.c.bf16 %v1706_v8, %v1690_v5  ;;  %v1713_v2 = vpop.permute.xlu0 %1712  ;;  %v2621_v46 = vpack.c.bf16 %v1709_v18, %v1693_v6 }
 0x870   :  { %v1720_v22 = vsel %vm250_vm2, %v1711_v15, %v1713_v2 }
 0x871   :  { %2608 = vmatpush1.bf16.msra.mxu0 %v2607_v4  ;;  %2622 = vmatprep.subr.bf16.mxu1 %v2621_v46  ;;  %v1723_v19 = vmul.f32 %v1720_v22, %v2896_v58 }
 0x872   :  { %2624 = vmatpush1.bf16.msra.mxu1 %v2623_v34  ;;  %v1715_v56 = vpop.permute.xlu1 %1714 }
 0x873   :  { %v1717_v1 = vpop.permute.xlu0 %1716  ;;  %v1719_v55 = vsel %vm250_vm2, %v1713_v2, %v1715_v56 }
 0x874   :  { %v1718_v52 = vsel %vm250_vm2, %v1715_v56, %v1717_v1  ;;  %v1721_v34 = vsel %vm250_vm2, %v1717_v1, %v1711_v15  ;;  %v1724_v56 = vmul.f32 %v1719_v55, %v2907_v62 }
 0x875   :  { %v1722_v22 = vmul.f32 %v1721_v34, %v2904_v61  ;;  %v1725_v15 = vmul.f32 %v1718_v52, %v2910_v63 }
 0x876   :  { %v1727_v49 = vpop.permute.xlu1 %1726 }
 0x877   :  { %v1729_v23 = vpop.permute.xlu0 %1728 }
 0x878   :  { %v1736_v0 = vsel %vm267_vm3, %v1727_v49, %v1729_v23 }
 0x879   :  { %v1739_v5 = vmul.f32 %v1736_v0, %v2899_v59 }
 0x87a   :  { %v1731_v57 = vpop.permute.xlu1 %1730 }
 0x87b   :  { %v1735_v6 = vsel %vm267_vm3, %v1729_v23, %v1731_v57  ;;  %v1733_v8 = vpop.permute.xlu0 %1732  ;;  %v2609_v18 = vpack.c.bf16 %v1739_v5, %v1723_v19 }
 0x87c   :  { %v1740_v60 = vmul.f32 %v1735_v6, %v2920_v10  ;;  %v1734_v4 = vsel %vm267_vm3, %v1731_v57, %v1733_v8  ;;  %v1737_v46 = vsel %vm267_vm3, %v1733_v8, %v1727_v49 }
 0x87d   :  { %v1738_v1 = vmul.f32 %v1737_v46, %v2917_v9  ;;  %v1741_v2 = vmul.f32 %v1734_v4, %v2927_v16  ;;  %2610 = vmatprep.subr.bf16.mxu0 %v2609_v18 }
 0x87e   :  { %v1743_v23 = vpop.permute.xlu1 %1742  ;;  %v2627_v6 = vpack.c.bf16 %v1740_v60, %v1724_v56 }
 0x87f   :  { %v2611_v0 = vpack.c.bf16 %v1738_v1, %v1722_v22  ;;  %v1745_v19 = vpop.permute.xlu0 %1744  ;;  %v2625_v5 = vpack.c.bf16 %v1741_v2, %v1725_v15 }
 0x880   :  { %v1752_v57 = vsel %vm284_vm4, %v1743_v23, %v1745_v19 }
 0x881   :  { %2612 = vmatpush1.bf16.msra.mxu0 %v2611_v0  ;;  %2626 = vmatprep.subr.bf16.mxu1 %v2625_v5  ;;  %v1754_v52 = vmul.f32 %v1752_v57, %v2948_v47 }
 0x882   :  { %2628 = vmatpush1.bf16.msra.mxu1 %v2627_v6  ;;  %v1747_v49 = vpop.permute.xlu1 %1746 }
 0x883   :  { %v1751_v34 = vsel %vm284_vm4, %v1745_v19, %v1747_v49  ;;  %v1749_v8 = vpop.permute.xlu0 %1748  ;;  %v2615_v1 = vpack.c.bf16 %v1754_v52, %v3668_v53 }
 0x884   :  { %v1755_v55 = vmul.f32 %v1751_v34, %v2956_v50  ;;  %v1750_v18 = vsel %vm284_vm4, %v1747_v49, %v1749_v8  ;;  %v1753_v60 = vsel %vm284_vm4, %v1749_v8, %v1743_v23 }
 0x885   :  { %v1756_v4 = vmul.f32 %v1750_v18, %v2959_v51  ;;  %v1757_v46 = vmul.f32 %v1753_v60, %v2951_v48 }
 0x886   :  { %v1759_v22 = vpop.permute.xlu1 %1758  ;;  %v2613_v15 = vpack.c.bf16 %v1755_v55, %v3670_v35 }
 0x887   :  { %v2631_v2 = vpack.c.bf16 %v1756_v4, %v3676_v14  ;;  %v1761_v56 = vpop.permute.xlu0 %1760  ;;  %v2629_v0 = vpack.c.bf16 %v1757_v46, %v3678_v28 }
 0x888   :  { %2614 = vmatprep.subr.bf16.mxu0 %v2613_v15  ;;  %v1768_v57 = vsel %vm301_vm6, %v1759_v22, %v1761_v56 }
 0x889   :  { %2616 = vmatpush1.bf16.msra.mxu0 %v2615_v1  ;;  %2630 = vmatprep.subr.bf16.mxu1 %v2629_v0  ;;  %v1770_v18 = vmul.f32 %v1768_v57, %v3011_v45 }
 0x88a   :  { %2632 = vmatpush1.bf16.msra.mxu1 %v2631_v2  ;;  %v1763_v19 = vpop.permute.xlu1 %1762 }
 0x88b   :  { %v1765_v23 = vpop.permute.xlu0 %1764  ;;  %v1767_v52 = vsel %vm301_vm6, %v1761_v56, %v1763_v19 }
 0x88c   :  { %v1766_v34 = vsel %vm301_vm6, %v1763_v19, %v1765_v23  ;;  %v1769_v8 = vsel %vm301_vm6, %v1765_v23, %v1759_v22  ;;  %v1771_v15 = vmul.f32 %v1767_v52, %v2987_v33 }
 0x88d   :  { %v1772_v22 = vmul.f32 %v1766_v34, %v2992_v38  ;;  %v1773_v0 = vmul.f32 %v1769_v8, %v2984_v32 }
 0x88e   :  { %v1775_v5 = vpop.permute.xlu1 %1774 }
 0x88f   :  { %v1777_v6 = vpop.permute.xlu0 %1776 }
 0x890   :  { %v1784_v49 = vsel %vm318_vm5, %v1775_v5, %v1777_v6 }
 0x891   :  { %v1786_v60 = vmul.f32 %v1784_v49, %v2997_v40 }
 0x892   :  { %v1779_v55 = vpop.permute.xlu1 %1778 }
 0x893   :  { %v1783_v4 = vsel %vm318_vm5, %v1777_v6, %v1779_v55  ;;  %v1781_v46 = vpop.permute.xlu0 %1780  ;;  %v2619_v49 = vpack.c.bf16 %v1786_v60, %v1770_v18 }
 0x894   :  { %v1787_v1 = vmul.f32 %v1783_v4, %v3005_v43  ;;  %v1782_v2 = vsel %vm318_vm5, %v1779_v55, %v1781_v46  ;;  %v1785_v56 = vsel %vm318_vm5, %v1781_v46, %v1775_v5 }
 0x895   :  { %v1788_v19 = vmul.f32 %v1782_v2, %v3008_v44  ;;  %v1789_v23 = vmul.f32 %v1785_v56, %v3002_v42  ;;  %v2447_v56 = vld [vmem:[%s4065_s2 + $0x20] sm:$0xff] }
 0x896   :  { %v1791_v6 = vpop.permute.xlu1 %1790  ;;  %v2617_v57 = vpack.c.bf16 %v1787_v1, %v1771_v15 }
 0x897   :  { %v2635_v52 = vpack.c.bf16 %v1788_v19, %v1772_v22  ;;  %v1793_v29 = vpop.permute.xlu0 %1792  ;;  %v2633_v4 = vpack.c.bf16 %v1789_v23, %v1773_v0 }
 0x898   :  { %2618 = vmatprep.subr.bf16.mxu0 %v2617_v57  ;;  %v1800_v5 = vsel %vm335_vm7, %v1791_v6, %v1793_v29 }
 0x899   :  { %2620 = vmatpush1.bf16.msra.mxu0 %v2619_v49  ;;  %2634 = vmatprep.subr.bf16.mxu1 %v2633_v4  ;;  %v1802_v15 = vmul.f32 %v1800_v5, %v3045_v41 }
 0x89a   :  { %2636 = vmatpush1.bf16.msra.mxu1 %v2635_v52  ;;  %v1795_v34 = vpop.permute.xlu1 %1794 }
 0x89b   :  { %v1799_v8 = vsel %vm335_vm7, %v1793_v29, %v1795_v34  ;;  %v1797_v55 = vpop.permute.xlu0 %1796 }
 0x89c   :  { %v1803_v46 = vmul.f32 %v1799_v8, %v3036_v36  ;;  %v1798_v18 = vsel %vm335_vm7, %v1795_v34, %v1797_v55  ;;  %v1801_v60 = vsel %vm335_vm7, %v1797_v55, %v1791_v6  ;;  %v2452_v55 = vld [vmem:[%s4063_s3 + $0x28] sm:$0xff] }
 0x89d   :  { %v1804_v1 = vmul.f32 %v1798_v18, %v3042_v39  ;;  %v1805_v2 = vmul.f32 %v1801_v60, %v3039_v37 }
 0x89e   :  { %1832 = vmatprep.subr.mxu0 %v1803_v46  ;;  %v2456_v46 = vld [vmem:[%s4063_s3 + $0x40] sm:$0xff] }
 0x89f   :  { %1833 = vmatpush1.msra.mxu0 %v1802_v15  ;;  %1903 = vmatprep.subr.mxu1 %v1805_v2 }
 0x8a0   :  { %2449 = vmatmul.mubr.msk.f32.vlgmr.msra.gmra.mrb[12].mxu0 %vm350_vm8, %v2447_v56  ;;  %1904 = vmatpush1.msra.mxu1 %v1804_v1 }
 0x8a1   :  { %2450 = vmatmul.mubr.msk.f32.vlgmr.msra.gmra.mrb[12].mxu1 %vm350_vm8, %v2447_v56  ;;  %2166 = vmatprep.mubr.f32.mxu0 %v4076_v17 }
 0x8a2   :  { %2237 = vmatprep.mubr.f32.mxu1 %v4076_v17 }
 0x8ab   :  { %v1811_v29 = vpop.permute.xlu1 %1810 }
 0x973   :  { %v1882_v22 = vpop.f32.mrb[12].mxu0 }
 0x974   :  { %v1883_v0 = vadd.f32 %v1882_v22, %v1811_v29  ;;  %v1884_v19 = vpop.f32.mrb[13].mxu0  ;;  %v1953_v23 = vpop.f32.mrb[12].mxu1 }
 0x975   :  { %v1885_v6 = vadd.f32 %v1884_v19, %v1811_v29  ;;  %v1955_v57 = vpop.f32.mrb[13].mxu1  ;;  %v1954_v52 = vadd.f32 %v1953_v23, %v1811_v29 }
 0x976   :  { %v3850_v49 = vmax.f32 %v1883_v0, 0.0  ;;  %v1956_v5 = vadd.f32 %v1955_v57, %v1811_v29 }
 0x977   :  { %v3852_v4 = vmax.f32 %v1885_v6, 0.0  ;;  %v3858_v34 = vmax.f32 %v1954_v52, 0.0 }
 0x978   :  { %1964 = vrot.lane.b32.xlu0 %v3850_v49, %s2697_s19  ;;  %v3860_v8 = vmax.f32 %v1956_v5, 0.0 }
 0x979   :  { %1966 = vrot.lane.b32.xlu1 %v3852_v4, %s2697_s19 }
 0x97c   :  { %1968 = vrot.lane.b32.xlu0 %v3858_v34, %s2697_s19 }
 0x97d   :  { %1970 = vrot.lane.b32.xlu1 %v3860_v8, %s2697_s19 }
 0x980   :  { %1980 = vrot.lane.b32.xlu0 %v3850_v49, %s2698_s24 }
 0x981   :  { %1982 = vrot.lane.b32.xlu1 %v3852_v4, %s2698_s24 }
 0x984   :  { %1984 = vrot.lane.b32.xlu0 %v3858_v34, %s2698_s24 }
 0x985   :  { %1986 = vrot.lane.b32.xlu1 %v3860_v8, %s2698_s24 }
 0x988   :  { %1996 = vrot.lane.b32.xlu0 %v3850_v49, %s2699_s0 }
 0x989   :  { %1998 = vrot.lane.b32.xlu1 %v3852_v4, %s2699_s0 }
 0x98c   :  { %2000 = vrot.lane.b32.xlu0 %v3858_v34, %s2699_s0 }
 0x98d   :  { %2002 = vrot.lane.b32.xlu1 %v3860_v8, %s2699_s0 }
 0x990   :  { %2012 = vrot.lane.b32.xlu0 %v3850_v49, %s2700_s25 }
 0x991   :  { %2014 = vrot.lane.b32.xlu1 %v3852_v4, %s2700_s25 }
 0x994   :  { %2016 = vrot.lane.b32.xlu0 %v3858_v34, %s2700_s25 }
 0x995   :  { %2018 = vrot.lane.b32.xlu1 %v3860_v8, %s2700_s25 }
 0x998   :  { %2028 = vrot.lane.b32.xlu0 %v3850_v49, %s2701_s26 }
 0x999   :  { %2030 = vrot.lane.b32.xlu1 %v3852_v4, %s2701_s26 }
 0x99c   :  { %2032 = vrot.lane.b32.xlu0 %v3858_v34, %s2701_s26 }
 0x99d   :  { %2034 = vrot.lane.b32.xlu1 %v3860_v8, %s2701_s26 }
 0x9a0   :  { %2044 = vrot.lane.b32.xlu0 %v3850_v49, %s2702_s27 }
 0x9a1   :  { %2046 = vrot.lane.b32.xlu1 %v3852_v4, %s2702_s27 }
 0x9a4   :  { %2048 = vrot.lane.b32.xlu0 %v3858_v34, %s2702_s27 }
 0x9a5   :  { %2050 = vrot.lane.b32.xlu1 %v3860_v8, %s2702_s27 }
 0x9a8   :  { %2060 = vrot.lane.b32.xlu0 %v3850_v49, %s2703_s28 }
 0x9a9   :  { %2062 = vrot.lane.b32.xlu1 %v3852_v4, %s2703_s28 }
 0x9ac   :  { %2064 = vrot.lane.b32.xlu0 %v3858_v34, %s2703_s28 }
 0x9ad   :  { %2066 = vrot.lane.b32.xlu1 %v3860_v8, %s2703_s28 }
 0x9b0   :  { %2076 = vrot.lane.b32.xlu0 %v3850_v49, %s2706_s29 }
 0x9b1   :  { %2078 = vrot.lane.b32.xlu1 %v3852_v4, %s2706_s29 }
 0x9b4   :  { %2080 = vrot.lane.b32.xlu0 %v3858_v34, %s2706_s29 }
 0x9b5   :  { %2082 = vrot.lane.b32.xlu1 %v3860_v8, %s2706_s29 }
 0x9b8   :  { %2096 = vperm.xlu0 %2695, %v2452_v55  }
 0x9b9   :  { %2254 = vperm.xlu1 %2696, %v2456_v46  }
 0x9ea   :  { %v1965_v18 = vpop.permute.xlu0 %1964 }
 0x9eb   :  { %v1967_v60 = vpop.permute.xlu1 %1966 }
 0x9ec   :  { %v1974_v2 = vsel %vm216_vm0, %v1965_v18, %v1967_v60 }
 0x9ed   :  { %v1977_v0 = vmul.f32 %v1974_v2, %v2840_v20 }
 0x9ee   :  { %v1969_v15 = vpop.permute.xlu0 %1968 }
 0x9ef   :  { %v1971_v1 = vpop.permute.xlu1 %1970  ;;  %v1973_v52 = vsel %vm216_vm0, %v1967_v60, %v1969_v15 }
 0x9f0   :  { %v1972_v23 = vsel %vm216_vm0, %v1969_v15, %v1971_v1  ;;  %v1975_v6 = vsel %vm216_vm0, %v1971_v1, %v1965_v18  ;;  %v1978_v15 = vmul.f32 %v1973_v52, %v2864_v31 }
 0x9f1   :  { %v1976_v2 = vmul.f32 %v1975_v6, %v2848_v25  ;;  %v1979_v18 = vmul.f32 %v1972_v23, %v2854_v27 }
 0x9f2   :  { %v1981_v56 = vpop.permute.xlu0 %1980 }
 0x9f3   :  { %v1983_v29 = vpop.permute.xlu1 %1982 }
 0x9f4   :  { %v1990_v22 = vsel %vm233_vm1, %v1981_v56, %v1983_v29 }
 0x9f5   :  { %v1993_v19 = vmul.f32 %v1990_v22, %v2843_v21 }
 0x9f6   :  { %v1985_v57 = vpop.permute.xlu0 %1984 }
 0x9f7   :  { %v1989_v5 = vsel %vm233_vm1, %v1983_v29, %v1985_v57  ;;  %v1987_v55 = vpop.permute.xlu1 %1986  ;;  %v2637_v46 = vpack.c.bf16 %v1993_v19, %v1977_v0 }
 0x9f8   :  { %v1994_v24 = vmul.f32 %v1989_v5, %v4081_v54  ;;  %v1988_v20 = vsel %vm233_vm1, %v1985_v57, %v1987_v55  ;;  %v1991_v21 = vsel %vm233_vm1, %v1987_v55, %v1981_v56 }
 0x9f9   :  { %v1992_v1 = vmul.f32 %v1991_v21, %v2851_v26  ;;  %v1995_v60 = vmul.f32 %v1988_v20, %v2861_v30  ;;  %2638 = vmatprep.subr.bf16.mxu0 %v2637_v46 }
 0x9fa   :  { %v1997_v29 = vpop.permute.xlu0 %1996  ;;  %v2655_v19 = vpack.c.bf16 %v1994_v24, %v1978_v15 }
 0x9fb   :  { %v2639_v22 = vpack.c.bf16 %v1992_v1, %v1976_v2  ;;  %v1999_v54 = vpop.permute.xlu1 %1998  ;;  %v2653_v0 = vpack.c.bf16 %v1995_v60, %v1979_v18 }
 0x9fc   :  { %v2006_v25 = vsel %vm250_vm2, %v1997_v29, %v1999_v54 }
 0x9fd   :  { %2640 = vmatpush1.bf16.msra.mxu0 %v2639_v22  ;;  %2654 = vmatprep.subr.bf16.mxu1 %v2653_v0  ;;  %v2009_v31 = vmul.f32 %v2006_v25, %v2896_v58 }
 0x9fe   :  { %2656 = vmatpush1.bf16.msra.mxu1 %v2655_v19  ;;  %v2001_v56 = vpop.permute.xlu0 %2000 }
 0x9ff   :  { %v2003_v57 = vpop.permute.xlu1 %2002  ;;  %v2005_v5 = vsel %vm250_vm2, %v1999_v54, %v2001_v56 }
 0xa00   :  { %v2004_v24 = vsel %vm250_vm2, %v2001_v56, %v2003_v57  ;;  %v2007_v6 = vsel %vm250_vm2, %v2003_v57, %v1997_v29  ;;  %v2010_v15 = vmul.f32 %v2005_v5, %v2907_v62 }
 0xa01   :  { %v2008_v2 = vmul.f32 %v2007_v6, %v2904_v61  ;;  %v2011_v18 = vmul.f32 %v2004_v24, %v2910_v63 }
 0xa02   :  { %v2013_v27 = vpop.permute.xlu0 %2012 }
 0xa03   :  { %v2015_v26 = vpop.permute.xlu1 %2014 }
 0xa04   :  { %v2022_v30 = vsel %vm267_vm3, %v2013_v27, %v2015_v26 }
 0xa05   :  { %v2025_v23 = vmul.f32 %v2022_v30, %v2899_v59 }
 0xa06   :  { %v2017_v52 = vpop.permute.xlu0 %2016 }
 0xa07   :  { %v2021_v55 = vsel %vm267_vm3, %v2015_v26, %v2017_v52  ;;  %v2019_v46 = vpop.permute.xlu1 %2018  ;;  %v2641_v20 = vpack.c.bf16 %v2025_v23, %v2009_v31 }
 0xa08   :  { %v2026_v21 = vmul.f32 %v2021_v55, %v2920_v10  ;;  %v2020_v58 = vsel %vm267_vm3, %v2017_v52, %v2019_v46  ;;  %v2023_v59 = vsel %vm267_vm3, %v2019_v46, %v2013_v27 }
 0xa09   :  { %v2024_v1 = vmul.f32 %v2023_v59, %v2917_v9  ;;  %v2027_v60 = vmul.f32 %v2020_v58, %v2927_v16  ;;  %2642 = vmatprep.subr.bf16.mxu0 %v2641_v20 }
 0xa0a   :  { %v2029_v29 = vpop.permute.xlu0 %2028  ;;  %v2659_v0 = vpack.c.bf16 %v2026_v21, %v2010_v15 }
 0xa0b   :  { %v2643_v22 = vpack.c.bf16 %v2024_v1, %v2008_v2  ;;  %v2031_v10 = vpop.permute.xlu1 %2030  ;;  %v2657_v54 = vpack.c.bf16 %v2027_v60, %v2011_v18 }
 0xa0c   :  { %v2038_v19 = vsel %vm284_vm4, %v2029_v29, %v2031_v10 }
 0xa0d   :  { %2644 = vmatpush1.bf16.msra.mxu0 %v2643_v22  ;;  %2658 = vmatprep.subr.bf16.mxu1 %v2657_v54  ;;  %v2040_v63 = vmul.f32 %v2038_v19, %v2948_v47 }
 0xa0e   :  { %2660 = vmatpush1.bf16.msra.mxu1 %v2659_v0  ;;  %v2033_v61 = vpop.permute.xlu0 %2032 }
 0xa0f   :  { %v2037_v9 = vsel %vm284_vm4, %v2031_v10, %v2033_v61  ;;  %v2035_v16 = vpop.permute.xlu1 %2034  ;;  %v2647_v47 = vpack.c.bf16 %v2040_v63, %v3850_v49 }
 0xa10   :  { %v2041_v62 = vmul.f32 %v2037_v9, %v2956_v50  ;;  %v2036_v56 = vsel %vm284_vm4, %v2033_v61, %v2035_v16  ;;  %v2039_v57 = vsel %vm284_vm4, %v2035_v16, %v2029_v29  ;;  %v2451_v16 = vld [vmem:[%s4065_s2 + $0x28] sm:$0xff] }
 0xa11   :  { %v2042_v25 = vmul.f32 %v2036_v56, %v2959_v51  ;;  %v2043_v27 = vmul.f32 %v2039_v57, %v2951_v48 }
 0xa12   :  { %v2045_v26 = vpop.permute.xlu0 %2044  ;;  %v2645_v30 = vpack.c.bf16 %v2041_v62, %v3852_v4 }
 0xa13   :  { %v2663_v31 = vpack.c.bf16 %v2042_v25, %v3858_v34  ;;  %v2047_v23 = vpop.permute.xlu1 %2046  ;;  %v2661_v50 = vpack.c.bf16 %v2043_v27, %v3860_v8  ;;  %v4082_v27 = vld [vmem:[#allocation3_spill] sm:$0xff] }
 0xa14   :  { %2646 = vmatprep.subr.bf16.mxu0 %v2645_v30  ;;  %v2054_v48 = vsel %vm301_vm6, %v2045_v26, %v2047_v23 }
 0xa15   :  { %2648 = vmatpush1.bf16.msra.mxu0 %v2647_v47  ;;  %2662 = vmatprep.subr.bf16.mxu1 %v2661_v50  ;;  %v2056_v55 = vmul.f32 %v2054_v48, %v3011_v45  ;;  %v4084_v47 = vld [vmem:[#allocation5_spill] sm:$0xff] }
 0xa16   :  { %2664 = vmatpush1.bf16.msra.mxu1 %v2663_v31  ;;  %v2049_v24 = vpop.permute.xlu0 %2048 }
 0xa17   :  { %v2051_v6 = vpop.permute.xlu1 %2050  ;;  %v2053_v49 = vsel %vm301_vm6, %v2047_v23, %v2049_v24  ;;  %v4085_v23 = vld [vmem:[#allocation6_spill] sm:$0xff] }
 0xa18   :  { %v2052_v34 = vsel %vm301_vm6, %v2049_v24, %v2051_v6  ;;  %v2055_v8 = vsel %vm301_vm6, %v2051_v6, %v2045_v26  ;;  %v2057_v58 = vmul.f32 %v2053_v49, %v2987_v33 }
 0xa19   :  { %v2058_v1 = vmul.f32 %v2052_v34, %v2992_v38  ;;  %v2059_v45 = vmul.f32 %v2055_v8, %v2984_v32 }
 0xa1a   :  { %v2061_v52 = vpop.permute.xlu0 %2060 }
 0xa1b   :  { %v2063_v51 = vpop.permute.xlu1 %2062 }
 0xa1c   :  { %v2070_v4 = vsel %vm318_vm5, %v2061_v52, %v2063_v51 }
 0xa1d   :  { %v2072_v46 = vmul.f32 %v2070_v4, %v2997_v40 }
 0xa1e   :  { %v2065_v5 = vpop.permute.xlu0 %2064 }
 0xa1f   :  { %v2069_v20 = vsel %vm318_vm5, %v2063_v51, %v2065_v5  ;;  %v2067_v21 = vpop.permute.xlu1 %2066  ;;  %v2651_v22 = vpack.c.bf16 %v2072_v46, %v2056_v55 }
 0xa20   :  { %v2073_v59 = vmul.f32 %v2069_v20, %v3005_v43  ;;  %v2068_v2 = vsel %vm318_vm5, %v2065_v5, %v2067_v21  ;;  %v2071_v18 = vsel %vm318_vm5, %v2067_v21, %v2061_v52 }
 0xa21   :  { %v2074_v40 = vmul.f32 %v2068_v2, %v3008_v44  ;;  %v2075_v60 = vmul.f32 %v2071_v18, %v3002_v42 }
 0xa22   :  { %v2077_v15 = vpop.permute.xlu0 %2076  ;;  %v2649_v29 = vpack.c.bf16 %v2073_v59, %v2057_v58 }
 0xa23   :  { %v2667_v33 = vpack.c.bf16 %v2074_v40, %v2058_v1  ;;  %v2079_v10 = vpop.permute.xlu1 %2078  ;;  %v2665_v43 = vpack.c.bf16 %v2075_v60, %v2059_v45 }
 0xa24   :  { %2650 = vmatprep.subr.bf16.mxu0 %v2649_v29  ;;  %v2086_v54 = vsel %vm335_vm7, %v2077_v15, %v2079_v10 }
 0xa25   :  { %2652 = vmatpush1.bf16.msra.mxu0 %v2651_v22  ;;  %2666 = vmatprep.subr.bf16.mxu1 %v2665_v43  ;;  %v2088_v61 = vmul.f32 %v2086_v54, %v3045_v41 }
 0xa26   :  { %2668 = vmatpush1.bf16.msra.mxu1 %v2667_v33  ;;  %v2081_v38 = vpop.permute.xlu0 %2080 }
 0xa27   :  { %v2085_v32 = vsel %vm335_vm7, %v2079_v10, %v2081_v38  ;;  %v2083_v44 = vpop.permute.xlu1 %2082 }
 0xa28   :  { %v2089_v42 = vmul.f32 %v2085_v32, %v3036_v36  ;;  %v2084_v0 = vsel %vm335_vm7, %v2081_v38, %v2083_v44  ;;  %v2087_v19 = vsel %vm335_vm7, %v2083_v44, %v2077_v15 }
 0xa29   :  { %v2090_v63 = vmul.f32 %v2084_v0, %v3042_v39  ;;  %v2091_v9 = vmul.f32 %v2087_v19, %v3039_v37 }
 0xa2a   :  { %2118 = vmatprep.subr.mxu0 %v2089_v42 }
 0xa2b   :  { %2119 = vmatpush1.msra.mxu0 %v2088_v61  ;;  %2189 = vmatprep.subr.mxu1 %v2091_v9 }
 0xa2c   :  { %2453 = vmatmul.mubr.msk.f32.vlgmr.msra.gmra.mrb[14].mxu0 %vm350_vm8, %v2451_v16  ;;  %2190 = vmatpush1.msra.mxu1 %v2090_v63 }
 0xa2d   :  { %2670 = vmatprep.subr.bf16.mxu0 %v3254_v13  ;;  %2454 = vmatmul.mubr.msk.f32.vlgmr.msra.gmra.mrb[14].mxu1 %vm350_vm8, %v2451_v16 }
 0xa2e   :  { %2672 = vmatpush1.bf16.msra.mxu0 %v3257_v7  ;;  %2678 = vmatprep.subr.bf16.mxu1 %v3267_v12 }
 0xa2f   :  { %2680 = vmatpush1.bf16.msra.mxu1 %v3270_v3  ;;  %2325 = vmatprep.mubr.f32.mxu0 %v4076_v17 }
 0xa30   :  { %2396 = vmatprep.mubr.f32.mxu1 %v4076_v17  ;;  %v4083_v17 = vld [vmem:[#allocation4_spill] sm:$0xff] }
 0xa37   :  { %v2097_v11 = vpop.permute.xlu0 %2096 }
 0xaff   :  { %v2168_v36 = vpop.f32.mrb[14].mxu0 }
 0xb00   :  { %v2169_v37 = vadd.f32 %v2168_v36, %v2097_v11  ;;  %v2170_v39 = vpop.f32.mrb[15].mxu0  ;;  %v2239_v41 = vpop.f32.mrb[14].mxu1 }
 0xb01   :  { %v2171_v62 = vadd.f32 %v2170_v39, %v2097_v11  ;;  %v2240_v56 = vadd.f32 %v2239_v41, %v2097_v11  ;;  %v2241_v13 = vpop.f32.mrb[15].mxu1 }
 0xb02   :  { %v2244_v57 = vadd.f32 %v2169_v37, %v3668_v53  ;;  %v2242_v25 = vadd.f32 %v2241_v13, %v2097_v11  ;;  %v2455_v53 = vld [vmem:[%s4065_s2 + $0x40] sm:$0xff] }
 0xb03   :  { %v2245_v7 = vadd.f32 %v2171_v62, %v3670_v35  ;;  %v2246_v12 = vadd.f32 %v2240_v56, %v3676_v14  ;;  %v2255_v35 = vpop.permute.xlu1 %2254 }
 0xb04   :  { %v2247_v3 = vadd.f32 %v2242_v25, %v3678_v28  ;;  %v2675_v30 = vpack.c.bf16 %v2244_v57, %v4083_v17 }
 0xb05   :  { %v2673_v26 = vpack.c.bf16 %v2245_v7, %v4082_v27  ;;  %v2683_v50 = vpack.c.bf16 %v2246_v12, %v4085_v23 }
 0xb06   :  { %v2681_v31 = vpack.c.bf16 %v2247_v3, %v4084_v47 }
 0xb07   :  { %2674 = vmatprep.subr.bf16.mxu0 %v2673_v26 }
 0xb08   :  { %2676 = vmatpush1.bf16.msra.mxu0 %v2675_v30  ;;  %2682 = vmatprep.subr.bf16.mxu1 %v2681_v31 }
 0xb09   :  { %2684 = vmatpush1.bf16.msra.mxu1 %v2683_v50 }
 0xb0b   :  { %2457 = vmatmul.mubr.msk.f32.vlgmr.msra.gmra.mrb[16].mxu0 %vm2257_vm11, %v2455_v53 }
 0xb0c   :  { %2458 = vmatmul.mubr.msk.f32.vlgmr.msra.gmra.mrb[16].mxu1 %vm2257_vm11, %v2455_v53 }
 0xbde   :  { %v2327_v14 = vpop.f32.mrb[16].mxu0 }
 0xbdf   :  { %v2328_v28 = vadd.f32 %v2327_v14, %v2255_v35  ;;  %v2329_v24 = vpop.f32.mrb[17].mxu0  ;;  %v2398_v6 = vpop.f32.mrb[16].mxu1 }
 0xbe0   :  { %v2330_v52 = vadd.f32 %v2329_v24, %v2255_v35  ;;  %v2399_v51 = vadd.f32 %v2398_v6, %v2255_v35  ;;  %v2400_v48 = vpop.f32.mrb[17].mxu1 }
 0xbe1   :  { %v2403_v4 = vmax.f32 %v2328_v28, 0.0  ;;  %v2401_v49 = vadd.f32 %v2400_v48, %v2255_v35 }
 0xbe2   :  { %v2404_v34 = vmax.f32 %v2330_v52, 0.0  ;;  %v2405_v8 = vmax.f32 %v2399_v51, 0.0 }
 0xbe3   :  { %2407 = vst [vmem:[%s4066_s4] sm:$0xff] %v2403_v4  ;;  %v2406_v5 = vmax.f32 %v2401_v49, 0.0 }
 0xbe4   :  { %2408 = vst [vmem:[%s4066_s4 + $0x8] sm:$0xff] %v2404_v34  ;;  %2459 = vst [vmem:[%s4066_s4 + $0x10] sm:$0xff] %v2405_v8 }
 0xbe5   :  { %2460 = vst [vmem:[%s4066_s4 + $0x18] sm:$0xff] %v2406_v5 }

</bundles_post_ra>
